<compile_context>
chip_gen: v5e
topology: v5e:2x2
jax: 0.10.0
libtpu: 0.0.40
codegen_flags: <defaults>
</compile_context>

<pallas_src>
import functools

import jax
import jax.numpy as jnp
from jax import lax
from jax.experimental import pallas as pl
from jax.experimental.pallas import tpu as pltpu


def _vmem_bytes(th, W, C, Cmid):
    """Rough per-step VMEM footprint estimate (double-buffered I/O + scratch)."""
    act = 2 * 2 * (th * W * C * 2) + 2 * (2 * W * C * 2)      # x/out blocks + halo
    wts = 2 * ((C * Cmid + 9 * Cmid * C) * 2 + (Cmid + C) * 4)
    scr = (th + 2) * (W + 2) * Cmid * 2
    tmp = th * W * (9 * Cmid * 2 + Cmid * 4 + C * 4)          # im2col/taps + f32 temps
    return act + wts + scr + tmp


def _pick_row_block(H, W, C, Cmid, *, budget_bytes=40 << 20, max_rows=8):
    """Largest divisor of H (<= max_rows) whose block fits the VMEM budget."""
    best = H  # whole image is always a legal block shape (fallback, e.g. prime H)
    for th in range(1, min(H, max_rows) + 1):
        if H % th:
            continue
        if (th * W) % 8 and th != H:          # keep the row-block sublane aligned
            continue
        if _vmem_bytes(th, W, C, Cmid) <= budget_bytes:
            best = th
    return best


def _res_layer_kernel(x_ref, halo_ref, w1_ref, b1_ref, w2_ref, b2_ref,
                      out_ref, pad_ref, *, th, W, C, Cmid, use_im2col):
    # x_ref/out_ref : (TH*W, C)  bf16   (one row block, rows flattened into M)
    # halo_ref      : (2*W, C)   bf16   (row above / row below this block)
    # w1_ref        : (C, Cmid)  bf16   (1x1 conv, BN scale folded)
    # w2_ref        : (9*Cmid,C) bf16   (3x3 conv, im2col dh-major/dw/Cmid layout)
    # pad_ref       : (TH+2, W+2, Cmid) bf16 scratch (zero-padded layer1 output)
    rb = pl.program_id(1)
    nb = pl.num_programs(1)

    w1 = w1_ref[...]
    b1 = b1_ref[...]          # (1, Cmid) f32 (hoisted)
    b2 = b2_ref[...]          # (1, C)    f32 (hoisted)

    def layer1(x_bf16):       # (rows, C) bf16 -> (rows, Cmid) f32
        y = jnp.dot(x_bf16, w1, preferred_element_type=jnp.float32)
        y = y + b1
        return jnp.maximum(y, 0.1 * y)          # LeakyReLU(0.1): vmul + vmax

    # --- layer1 on the TH centre rows -> interior of the padded scratch -------
    y1c = layer1(x_ref[...])                                   # (TH*W, Cmid) f32
    pad_ref[1:th + 1, 1:W + 1, :] = (
        y1c.astype(jnp.bfloat16).reshape(th, W, Cmid))

    # --- layer1 on the 2 halo rows (recomputed; zeroed at image edges) --------
    y1h = layer1(halo_ref[...]).reshape(2, W, Cmid)            # f32
    keep_top = (rb > 0).astype(jnp.float32)
    keep_bot = (rb < nb - 1).astype(jnp.float32)
    pad_ref[0:1, 1:W + 1, :] = (y1h[0:1] * keep_top).astype(jnp.bfloat16)
    pad_ref[th + 1:th + 2, 1:W + 1, :] = (y1h[1:2] * keep_bot).astype(jnp.bfloat16)

    # --- zero the 1-pixel left/right padding columns (TH+2 rows only) ---------
    zcol = jnp.zeros((th + 2, 1, Cmid), jnp.bfloat16)
    pad_ref[:, 0:1, :] = zcol
    pad_ref[:, W + 1:W + 2, :] = zcol

    # --- layer2: 3x3 conv on the padded slab + bias + LeakyReLU ---------------
    if use_im2col:
        # Deep blocks (Cmid % 128 == 0): lane-aligned concat, one K=9*Cmid pass.
        slabs = [pad_ref[:, dw:dw + W, :] for dw in range(3)]     # (TH+2, W, Cmid)
        cols = [slabs[dw][dh:dh + th] for dh in range(3) for dw in range(3)]
        col = jnp.concatenate(cols, axis=-1).reshape(th * W, 9 * Cmid)
        y2 = jnp.dot(col, w2_ref[...], preferred_element_type=jnp.float32)
    else:
        # Shallow blocks (Cmid < 128): nine accumulating matmuls, no lane concat.
        y2 = jnp.zeros((th * W, C), jnp.float32)
        for t in range(9):
            dh, dw = divmod(t, 3)
            tap = pad_ref[dh:dh + th, dw:dw + W, :].reshape(th * W, Cmid)
            y2 = y2 + jnp.dot(tap, w2_ref[t * Cmid:(t + 1) * Cmid, :],
                              preferred_element_type=jnp.float32)
    y2 = y2 + b2
    y2 = jnp.maximum(y2, 0.1 * y2)

    # --- residual add (f32) -> bf16 store --------------------------------------
    out_ref[...] = (x_ref[...].astype(jnp.float32) + y2).astype(jnp.bfloat16)


def fold_params(w1_oihw, bn1, w2_oihw, bn2, eps=1e-3):
    """Fold eval-mode BN into the conv weights (host-side, one time).

    Returns:
      w1_mat : (C, Cmid)       bf16   (1x1 conv, scale folded)
      b1     : (1, Cmid)       f32
      w2_hwio: (3, 3, Cmid, C) bf16   (3x3 conv, scale folded)
      b2     : (1, C)          f32
    """
    g1, be1, m1, v1 = bn1
    g2, be2, m2, v2 = bn2
    s1 = g1 / jnp.sqrt(v1 + eps)
    b1 = be1 - m1 * s1
    s2 = g2 / jnp.sqrt(v2 + eps)
    b2 = be2 - m2 * s2
    w1_mat = (jnp.transpose(w1_oihw[:, :, 0, 0]) * s1).astype(jnp.bfloat16)
    w2_hwio = (jnp.transpose(w2_oihw, (2, 3, 1, 0)) * s2).astype(jnp.bfloat16)
    return (w1_mat, b1.reshape(1, -1).astype(jnp.float32),
            w2_hwio, b2.reshape(1, -1).astype(jnp.float32))


def res_layer_pallas(x_nchw, w1_mat, b1, w2_hwio, b2, *, row_block=8):
    N, C, H, W = x_nchw.shape
    Cmid = w1_mat.shape[1]
    th = _pick_row_block(H, W, C, Cmid, max_rows=row_block)
    nb = H // th
    use_im2col = (Cmid % 128 == 0)

    # NCHW f32 -> NHWC bf16 (bandwidth-bound: activation I/O in bf16).
    x_nhwc = jnp.transpose(x_nchw, (0, 2, 3, 1)).astype(jnp.bfloat16)   # (N,H,W,C)
    x_flat = x_nhwc.reshape(N, H * W, C)

    # Halo rows per block: [row rb*TH-1 ; row (rb+1)*TH] (zero placeholders at
    # the image edges; the kernel masks them, so zeros are never actually used).
    zero_row = jnp.zeros((N, 1, W, C), jnp.bfloat16)
    top = jnp.concatenate([zero_row, x_nhwc[:, th - 1:H - 1:th]], axis=1)   # (N,nb,W,C)
    bot = jnp.concatenate([x_nhwc[:, th:H:th], zero_row], axis=1)           # (N,nb,W,C)
    halo = jnp.concatenate([top, bot], axis=2)                              # (N,nb,2W,C)

    w2_mat = w2_hwio.reshape(9 * Cmid, C)                                   # im2col layout

    flops = int(2 * N * (H * W + nb * 2 * W) * Cmid * C      # layer1 (+halo recompute)
                + 2 * N * H * W * 9 * Cmid * C)              # layer2
    bytes_accessed = int(2 * N * H * W * C * 2               # x in + out (bf16)
                         + N * nb * 2 * W * C * 2            # halo rows
                         + w1_mat.size * 2 + w2_mat.size * 2
                         + (b1.size + b2.size) * 4)
    vmem_need = _vmem_bytes(th, W, C, Cmid)
    vmem_limit = int(min(max(2 * vmem_need, 32 << 20), 48 << 20))  # v7x-safe budget

    kernel = functools.partial(_res_layer_kernel, th=th, W=W, C=C, Cmid=Cmid,
                               use_im2col=use_im2col)
    out = pl.pallas_call(
        kernel,
        out_shape=jax.ShapeDtypeStruct((N, H * W, C), jnp.bfloat16),
        grid=(N, nb),
        in_specs=[
            pl.BlockSpec((None, th * W, C), lambda n, rb: (n, rb, 0)),       # x block
            pl.BlockSpec((None, None, 2 * W, C), lambda n, rb: (n, rb, 0, 0)),  # halo
            pl.BlockSpec((C, Cmid), lambda n, rb: (0, 0)),                   # w1 (bf16)
            pl.BlockSpec((1, Cmid), lambda n, rb: (0, 0)),                   # b1 (f32)
            pl.BlockSpec((9 * Cmid, C), lambda n, rb: (0, 0)),               # w2 (bf16)
            pl.BlockSpec((1, C), lambda n, rb: (0, 0)),                      # b2 (f32)
        ],
        out_specs=pl.BlockSpec((None, th * W, C), lambda n, rb: (n, rb, 0)),
        scratch_shapes=[pltpu.VMEM((th + 2, W + 2, Cmid), jnp.bfloat16)],
        compiler_params=pltpu.CompilerParams(
            dimension_semantics=("parallel", "parallel"),
            vmem_limit_bytes=vmem_limit),
        cost_estimate=pl.CostEstimate(flops=flops, transcendentals=0,
                                      bytes_accessed=bytes_accessed),
    )(x_flat, halo, w1_mat, b1, w2_mat, b2)

    out = out.reshape(N, H, W, C)
    return jnp.transpose(out, (0, 3, 1, 2)).astype(jnp.float32)   # NHWC -> NCHW


def reference_res_layer(x_nchw, w1_mat, b1, w2_hwio, b2):
    """Pure-JAX reference (lax.conv) with the same folded bf16 weights / bf16 x."""
    x = jnp.transpose(x_nchw, (0, 2, 3, 1)).astype(jnp.bfloat16)
    C = x.shape[-1]
    Cmid = w1_mat.shape[1]
    dn = ("NHWC", "HWIO", "NHWC")
    y = lax.conv_general_dilated(x, w1_mat.reshape(1, 1, C, Cmid), (1, 1), "VALID",
                                 dimension_numbers=dn,
                                 preferred_element_type=jnp.float32)
    y = y + b1.reshape(-1)
    y = jnp.maximum(y, 0.1 * y)
    y = lax.conv_general_dilated(y.astype(jnp.bfloat16), w2_hwio, (1, 1),
                                 ((1, 1), (1, 1)), dimension_numbers=dn,
                                 preferred_element_type=jnp.float32)
    y = y + b2.reshape(-1)
    y = jnp.maximum(y, 0.1 * y)
    out = x.astype(jnp.float32) + y
    return jnp.transpose(out, (0, 3, 1, 2))


if __name__ == "__main__":
    key = jax.random.PRNGKey(0)
    N, C, H, W = 2, 8, 16, 16
    Cmid = C // 2

    ks = jax.random.split(key, 11)
    x = jax.random.normal(ks[0], (N, C, H, W), jnp.float32)

    # PyTorch-layout conv weights: (Cout, Cin, kh, kw), no bias.
    w1_oihw = 0.1 * jax.random.normal(ks[1], (Cmid, C, 1, 1), jnp.float32)
    w2_oihw = 0.1 * jax.random.normal(ks[2], (C, Cmid, 3, 3), jnp.float32)

    # Eval-mode BatchNorm parameters (gamma, beta, running_mean, running_var).
    # TODO(synk): training-mode BatchNorm (batch statistics + running-stat
    # update) is not implemented; BN is folded in eval mode only.
    bn1 = (0.5 + jax.random.uniform(ks[3], (Cmid,), jnp.float32),
           0.1 * jax.random.normal(ks[4], (Cmid,), jnp.float32),
           0.1 * jax.random.normal(ks[5], (Cmid,), jnp.float32),
           0.5 + jax.random.uniform(ks[6], (Cmid,), jnp.float32))
    bn2 = (0.5 + jax.random.uniform(ks[7], (C,), jnp.float32),
           0.1 * jax.random.normal(ks[8], (C,), jnp.float32),
           0.1 * jax.random.normal(ks[9], (C,), jnp.float32),
           0.5 + jax.random.uniform(ks[10], (C,), jnp.float32))

    w1_mat, b1, w2_hwio, b2 = fold_params(w1_oihw, bn1, w2_oihw, bn2)

    out = res_layer_pallas(x, w1_mat, b1, w2_hwio, b2)
    out = jax.block_until_ready(out)

    ref = reference_res_layer(x, w1_mat, b1, w2_hwio, b2)
    assert out.shape == (N, C, H, W)
    err = float(jnp.max(jnp.abs(out - ref)))
    assert jnp.allclose(out, ref, atol=3e-2, rtol=2e-2), f"max abs err {err}"

    print("KERNEL_OK")
</pallas_src>

<mosaic_0001>
module attributes {stable_mosaic.version = 11 : i64} {
  func.func @_res_layer_kernel(%arg0: i32, %arg1: i32, %arg2: memref<1x128x8xbf16, #tpu.memory_space<vmem>>, %arg3: memref<1x1x32x8xbf16, #tpu.memory_space<vmem>>, %arg4: memref<8x4xbf16, #tpu.memory_space<vmem>>, %arg5: memref<1x4xf32, #tpu.memory_space<vmem>>, %arg6: memref<36x8xbf16, #tpu.memory_space<vmem>>, %arg7: memref<1x8xf32, #tpu.memory_space<vmem>>, %arg8: memref<1x128x8xbf16, #tpu.memory_space<vmem>>, %arg9: memref<10x18x4xbf16, #tpu.memory_space<vmem>>) attributes {dimension_semantics = [#tpu.dimension_semantics<parallel>, #tpu.dimension_semantics<parallel>], iteration_bounds = array<i64: 2, 2>, scalar_prefetch = 0 : i64, scratch_operands = 1 : i64, tpu.core_type = #tpu.core_type<tc>, window_params = [{transform_indices = @transform_0, window_bounds = array<i64: 1, 128, 8>}, {transform_indices = @transform_1, window_bounds = array<i64: 1, 1, 32, 8>}, {pipeline_mode = #tpu.pipeline_mode<synchronous>, transform_indices = @transform_2, window_bounds = array<i64: 8, 4>}, {pipeline_mode = #tpu.pipeline_mode<synchronous>, transform_indices = @transform_3, window_bounds = array<i64: 1, 4>}, {pipeline_mode = #tpu.pipeline_mode<synchronous>, transform_indices = @transform_4, window_bounds = array<i64: 36, 8>}, {pipeline_mode = #tpu.pipeline_mode<synchronous>, transform_indices = @transform_5, window_bounds = array<i64: 1, 8>}, {transform_indices = @transform_6, window_bounds = array<i64: 1, 128, 8>}]} {
    %c0 = arith.constant 0 : index
    %c0_0 = arith.constant 0 : index
    %0 = vector.load %arg4[%c0, %c0_0] : memref<8x4xbf16, #tpu.memory_space<vmem>>, vector<8x4xbf16>
    %c0_1 = arith.constant 0 : index
    %c0_2 = arith.constant 0 : index
    %1 = vector.load %arg5[%c0_1, %c0_2] : memref<1x4xf32, #tpu.memory_space<vmem>>, vector<1x4xf32>
    %c0_3 = arith.constant 0 : index
    %c0_4 = arith.constant 0 : index
    %2 = vector.load %arg7[%c0_3, %c0_4] : memref<1x8xf32, #tpu.memory_space<vmem>>, vector<1x8xf32>
    %c0_5 = arith.constant 0 : index
    %c0_6 = arith.constant 0 : index
    %c0_7 = arith.constant 0 : index
    %3 = vector.load %arg2[%c0_5, %c0_6, %c0_7] : memref<1x128x8xbf16, #tpu.memory_space<vmem>>, vector<1x128x8xbf16>
    %4 = vector.shape_cast %3 : vector<1x128x8xbf16> to vector<128x8xbf16>
    %cst = arith.constant dense<0.000000e+00> : vector<128x4xf32>
    %5 = tpu.matmul %4, %0, %cst {dimension_numbers = #tpu.dot_dimension_numbers<[1], [0], [0], [1], [0, 0, 1, 1], [], []>} : vector<128x8xbf16>, vector<8x4xbf16>, vector<128x4xf32> -> vector<128x4xf32>
    %6 = vector.broadcast %1 : vector<1x4xf32> to vector<128x4xf32>
    %7 = arith.addf %5, %6 : vector<128x4xf32>
    %cst_8 = arith.constant 1.000000e-01 : f32
    %8 = vector.broadcast %cst_8 : f32 to vector<128x4xf32>
    %9 = arith.mulf %8, %7 : vector<128x4xf32>
    %10 = arith.maximumf %7, %9 : vector<128x4xf32>
    %11 = arith.truncf %10 : vector<128x4xf32> to vector<128x4xbf16>
    %12 = vector.shape_cast %11 : vector<128x4xbf16> to vector<8x16x4xbf16>
    %c1 = arith.constant 1 : index
    %c1_9 = arith.constant 1 : index
    %c0_10 = arith.constant 0 : index
    %13 = vector.load %arg9[%c1, %c1_9, %c0_10] : memref<10x18x4xbf16, #tpu.memory_space<vmem>>, vector<8x16x4xbf16>
    tpu.vector_store %arg9[%c1, %c1_9, %c0_10], %12 {strides = array<i32>} : memref<10x18x4xbf16, #tpu.memory_space<vmem>>, vector<8x16x4xbf16>,
    %c0_11 = arith.constant 0 : index
    %c0_12 = arith.constant 0 : index
    %c0_13 = arith.constant 0 : index
    %c0_14 = arith.constant 0 : index
    %14 = vector.load %arg3[%c0_11, %c0_12, %c0_13, %c0_14] : memref<1x1x32x8xbf16, #tpu.memory_space<vmem>>, vector<1x1x32x8xbf16>
    %15 = vector.shape_cast %14 : vector<1x1x32x8xbf16> to vector<32x8xbf16>
    %cst_15 = arith.constant dense<0.000000e+00> : vector<32x4xf32>
    %16 = tpu.matmul %15, %0, %cst_15 {dimension_numbers = #tpu.dot_dimension_numbers<[1], [0], [0], [1], [0, 0, 1, 1], [], []>} : vector<32x8xbf16>, vector<8x4xbf16>, vector<32x4xf32> -> vector<32x4xf32>
    %17 = vector.broadcast %1 : vector<1x4xf32> to vector<32x4xf32>
    %18 = arith.addf %16, %17 : vector<32x4xf32>
    %cst_16 = arith.constant 1.000000e-01 : f32
    %19 = vector.broadcast %cst_16 : f32 to vector<32x4xf32>
    %20 = arith.mulf %19, %18 : vector<32x4xf32>
    %21 = arith.maximumf %18, %20 : vector<32x4xf32>
    %22 = vector.shape_cast %21 : vector<32x4xf32> to vector<2x16x4xf32>
    %c0_i32 = arith.constant 0 : i32
    %23 = arith.cmpi sgt, %arg1, %c0_i32 : i32
    %24 = arith.extui %23 : i1 to i32
    %25 = arith.sitofp %24 : i32 to f32
    %c1_i32 = arith.constant 1 : i32
    %26 = arith.cmpi slt, %arg1, %c1_i32 : i32
    %27 = arith.extui %26 : i1 to i32
    %28 = arith.sitofp %27 : i32 to f32
    %29 = vector.extract_strided_slice %22 {offsets = [0, 0, 0], sizes = [1, 16, 4], strides = [1, 1, 1]} : vector<2x16x4xf32> to vector<1x16x4xf32>
    %30 = vector.broadcast %25 : f32 to vector<1x16x4xf32>
    %31 = arith.mulf %29, %30 : vector<1x16x4xf32>
    %32 = arith.truncf %31 : vector<1x16x4xf32> to vector<1x16x4xbf16>
    %c0_17 = arith.constant 0 : index
    %c1_18 = arith.constant 1 : index
    %c0_19 = arith.constant 0 : index
    %33 = vector.load %arg9[%c0_17, %c1_18, %c0_19] : memref<10x18x4xbf16, #tpu.memory_space<vmem>>, vector<1x16x4xbf16>
    tpu.vector_store %arg9[%c0_17, %c1_18, %c0_19], %32 {strides = array<i32>} : memref<10x18x4xbf16, #tpu.memory_space<vmem>>, vector<1x16x4xbf16>,
    %34 = vector.extract_strided_slice %22 {offsets = [1, 0, 0], sizes = [1, 16, 4], strides = [1, 1, 1]} : vector<2x16x4xf32> to vector<1x16x4xf32>
    %35 = vector.broadcast %28 : f32 to vector<1x16x4xf32>
    %36 = arith.mulf %34, %35 : vector<1x16x4xf32>
    %37 = arith.truncf %36 : vector<1x16x4xf32> to vector<1x16x4xbf16>
    %c9 = arith.constant 9 : index
    %c1_20 = arith.constant 1 : index
    %c0_21 = arith.constant 0 : index
    %38 = vector.load %arg9[%c9, %c1_20, %c0_21] : memref<10x18x4xbf16, #tpu.memory_space<vmem>>, vector<1x16x4xbf16>
    tpu.vector_store %arg9[%c9, %c1_20, %c0_21], %37 {strides = array<i32>} : memref<10x18x4xbf16, #tpu.memory_space<vmem>>, vector<1x16x4xbf16>,
    %cst_22 = arith.constant 0.000000e+00 : bf16
    %39 = vector.broadcast %cst_22 : bf16 to vector<10x1x4xbf16>
    %c0_23 = arith.constant 0 : index
    %c0_24 = arith.constant 0 : index
    %c0_25 = arith.constant 0 : index
    %40 = vector.load %arg9[%c0_23, %c0_24, %c0_25] : memref<10x18x4xbf16, #tpu.memory_space<vmem>>, vector<10x1x4xbf16>
    tpu.vector_store %arg9[%c0_23, %c0_24, %c0_25], %39 {strides = array<i32>} : memref<10x18x4xbf16, #tpu.memory_space<vmem>>, vector<10x1x4xbf16>,
    %c0_26 = arith.constant 0 : index
    %c17 = arith.constant 17 : index
    %c0_27 = arith.constant 0 : index
    %41 = vector.load %arg9[%c0_26, %c17, %c0_27] : memref<10x18x4xbf16, #tpu.memory_space<vmem>>, vector<10x1x4xbf16>
    tpu.vector_store %arg9[%c0_26, %c17, %c0_27], %39 {strides = array<i32>} : memref<10x18x4xbf16, #tpu.memory_space<vmem>>, vector<10x1x4xbf16>,
    %cst_28 = arith.constant 0.000000e+00 : f32
    %42 = vector.broadcast %cst_28 : f32 to vector<128x8xf32>
    %c0_29 = arith.constant 0 : index
    %c0_30 = arith.constant 0 : index
    %c0_31 = arith.constant 0 : index
    %43 = vector.load %arg9[%c0_29, %c0_30, %c0_31] : memref<10x18x4xbf16, #tpu.memory_space<vmem>>, vector<8x16x4xbf16>
    %44 = vector.shape_cast %43 : vector<8x16x4xbf16> to vector<128x4xbf16>
    %c0_32 = arith.constant 0 : index
    %c0_33 = arith.constant 0 : index
    %45 = vector.load %arg6[%c0_32, %c0_33] : memref<36x8xbf16, #tpu.memory_space<vmem>>, vector<4x8xbf16>
    %cst_34 = arith.constant dense<0.000000e+00> : vector<128x8xf32>
    %46 = tpu.matmul %44, %45, %cst_34 {dimension_numbers = #tpu.dot_dimension_numbers<[1], [0], [0], [1], [0, 0, 1, 1], [], []>} : vector<128x4xbf16>, vector<4x8xbf16>, vector<128x8xf32> -> vector<128x8xf32>
    %47 = arith.addf %42, %46 : vector<128x8xf32>
    %c0_35 = arith.constant 0 : index
    %c1_36 = arith.constant 1 : index
    %c0_37 = arith.constant 0 : index
    %48 = vector.load %arg9[%c0_35, %c1_36, %c0_37] : memref<10x18x4xbf16, #tpu.memory_space<vmem>>, vector<8x16x4xbf16>
    %49 = vector.shape_cast %48 : vector<8x16x4xbf16> to vector<128x4xbf16>
    %c4 = arith.constant 4 : index
    %c0_38 = arith.constant 0 : index
    %50 = vector.load %arg6[%c4, %c0_38] : memref<36x8xbf16, #tpu.memory_space<vmem>>, vector<4x8xbf16>
    %cst_39 = arith.constant dense<0.000000e+00> : vector<128x8xf32>
    %51 = tpu.matmul %49, %50, %cst_39 {dimension_numbers = #tpu.dot_dimension_numbers<[1], [0], [0], [1], [0, 0, 1, 1], [], []>} : vector<128x4xbf16>, vector<4x8xbf16>, vector<128x8xf32> -> vector<128x8xf32>
    %52 = arith.addf %47, %51 : vector<128x8xf32>
    %c0_40 = arith.constant 0 : index
    %c2 = arith.constant 2 : index
    %c0_41 = arith.constant 0 : index
    %53 = vector.load %arg9[%c0_40, %c2, %c0_41] : memref<10x18x4xbf16, #tpu.memory_space<vmem>>, vector<8x16x4xbf16>
    %54 = vector.shape_cast %53 : vector<8x16x4xbf16> to vector<128x4xbf16>
    %c8 = arith.constant 8 : index
    %c0_42 = arith.constant 0 : index
    %55 = vector.load %arg6[%c8, %c0_42] : memref<36x8xbf16, #tpu.memory_space<vmem>>, vector<4x8xbf16>
    %cst_43 = arith.constant dense<0.000000e+00> : vector<128x8xf32>
    %56 = tpu.matmul %54, %55, %cst_43 {dimension_numbers = #tpu.dot_dimension_numbers<[1], [0], [0], [1], [0, 0, 1, 1], [], []>} : vector<128x4xbf16>, vector<4x8xbf16>, vector<128x8xf32> -> vector<128x8xf32>
    %57 = arith.addf %52, %56 : vector<128x8xf32>
    %c1_44 = arith.constant 1 : index
    %c0_45 = arith.constant 0 : index
    %c0_46 = arith.constant 0 : index
    %58 = vector.load %arg9[%c1_44, %c0_45, %c0_46] : memref<10x18x4xbf16, #tpu.memory_space<vmem>>, vector<8x16x4xbf16>
    %59 = vector.shape_cast %58 : vector<8x16x4xbf16> to vector<128x4xbf16>
    %c12 = arith.constant 12 : index
    %c0_47 = arith.constant 0 : index
    %60 = vector.load %arg6[%c12, %c0_47] : memref<36x8xbf16, #tpu.memory_space<vmem>>, vector<4x8xbf16>
    %cst_48 = arith.constant dense<0.000000e+00> : vector<128x8xf32>
    %61 = tpu.matmul %59, %60, %cst_48 {dimension_numbers = #tpu.dot_dimension_numbers<[1], [0], [0], [1], [0, 0, 1, 1], [], []>} : vector<128x4xbf16>, vector<4x8xbf16>, vector<128x8xf32> -> vector<128x8xf32>
    %62 = arith.addf %57, %61 : vector<128x8xf32>
    %c1_49 = arith.constant 1 : index
    %c1_50 = arith.constant 1 : index
    %c0_51 = arith.constant 0 : index
    %63 = vector.load %arg9[%c1_49, %c1_50, %c0_51] : memref<10x18x4xbf16, #tpu.memory_space<vmem>>, vector<8x16x4xbf16>
    %64 = vector.shape_cast %63 : vector<8x16x4xbf16> to vector<128x4xbf16>
    %c16 = arith.constant 16 : index
    %c0_52 = arith.constant 0 : index
    %65 = vector.load %arg6[%c16, %c0_52] : memref<36x8xbf16, #tpu.memory_space<vmem>>, vector<4x8xbf16>
    %cst_53 = arith.constant dense<0.000000e+00> : vector<128x8xf32>
    %66 = tpu.matmul %64, %65, %cst_53 {dimension_numbers = #tpu.dot_dimension_numbers<[1], [0], [0], [1], [0, 0, 1, 1], [], []>} : vector<128x4xbf16>, vector<4x8xbf16>, vector<128x8xf32> -> vector<128x8xf32>
    %67 = arith.addf %62, %66 : vector<128x8xf32>
    %c1_54 = arith.constant 1 : index
    %c2_55 = arith.constant 2 : index
    %c0_56 = arith.constant 0 : index
    %68 = vector.load %arg9[%c1_54, %c2_55, %c0_56] : memref<10x18x4xbf16, #tpu.memory_space<vmem>>, vector<8x16x4xbf16>
    %69 = vector.shape_cast %68 : vector<8x16x4xbf16> to vector<128x4xbf16>
    %c20 = arith.constant 20 : index
    %c0_57 = arith.constant 0 : index
    %70 = vector.load %arg6[%c20, %c0_57] : memref<36x8xbf16, #tpu.memory_space<vmem>>, vector<4x8xbf16>
    %cst_58 = arith.constant dense<0.000000e+00> : vector<128x8xf32>
    %71 = tpu.matmul %69, %70, %cst_58 {dimension_numbers = #tpu.dot_dimension_numbers<[1], [0], [0], [1], [0, 0, 1, 1], [], []>} : vector<128x4xbf16>, vector<4x8xbf16>, vector<128x8xf32> -> vector<128x8xf32>
    %72 = arith.addf %67, %71 : vector<128x8xf32>
    %c2_59 = arith.constant 2 : index
    %c0_60 = arith.constant 0 : index
    %c0_61 = arith.constant 0 : index
    %73 = vector.load %arg9[%c2_59, %c0_60, %c0_61] : memref<10x18x4xbf16, #tpu.memory_space<vmem>>, vector<8x16x4xbf16>
    %74 = vector.shape_cast %73 : vector<8x16x4xbf16> to vector<128x4xbf16>
    %c24 = arith.constant 24 : index
    %c0_62 = arith.constant 0 : index
    %75 = vector.load %arg6[%c24, %c0_62] : memref<36x8xbf16, #tpu.memory_space<vmem>>, vector<4x8xbf16>
    %cst_63 = arith.constant dense<0.000000e+00> : vector<128x8xf32>
    %76 = tpu.matmul %74, %75, %cst_63 {dimension_numbers = #tpu.dot_dimension_numbers<[1], [0], [0], [1], [0, 0, 1, 1], [], []>} : vector<128x4xbf16>, vector<4x8xbf16>, vector<128x8xf32> -> vector<128x8xf32>
    %77 = arith.addf %72, %76 : vector<128x8xf32>
    %c2_64 = arith.constant 2 : index
    %c1_65 = arith.constant 1 : index
    %c0_66 = arith.constant 0 : index
    %78 = vector.load %arg9[%c2_64, %c1_65, %c0_66] : memref<10x18x4xbf16, #tpu.memory_space<vmem>>, vector<8x16x4xbf16>
    %79 = vector.shape_cast %78 : vector<8x16x4xbf16> to vector<128x4xbf16>
    %c28 = arith.constant 28 : index
    %c0_67 = arith.constant 0 : index
    %80 = vector.load %arg6[%c28, %c0_67] : memref<36x8xbf16, #tpu.memory_space<vmem>>, vector<4x8xbf16>
    %cst_68 = arith.constant dense<0.000000e+00> : vector<128x8xf32>
    %81 = tpu.matmul %79, %80, %cst_68 {dimension_numbers = #tpu.dot_dimension_numbers<[1], [0], [0], [1], [0, 0, 1, 1], [], []>} : vector<128x4xbf16>, vector<4x8xbf16>, vector<128x8xf32> -> vector<128x8xf32>
    %82 = arith.addf %77, %81 : vector<128x8xf32>
    %c2_69 = arith.constant 2 : index
    %c2_70 = arith.constant 2 : index
    %c0_71 = arith.constant 0 : index
    %83 = vector.load %arg9[%c2_69, %c2_70, %c0_71] : memref<10x18x4xbf16, #tpu.memory_space<vmem>>, vector<8x16x4xbf16>
    %84 = vector.shape_cast %83 : vector<8x16x4xbf16> to vector<128x4xbf16>
    %c32 = arith.constant 32 : index
    %c0_72 = arith.constant 0 : index
    %85 = vector.load %arg6[%c32, %c0_72] : memref<36x8xbf16, #tpu.memory_space<vmem>>, vector<4x8xbf16>
    %cst_73 = arith.constant dense<0.000000e+00> : vector<128x8xf32>
    %86 = tpu.matmul %84, %85, %cst_73 {dimension_numbers = #tpu.dot_dimension_numbers<[1], [0], [0], [1], [0, 0, 1, 1], [], []>} : vector<128x4xbf16>, vector<4x8xbf16>, vector<128x8xf32> -> vector<128x8xf32>
    %87 = arith.addf %82, %86 : vector<128x8xf32>
    %88 = vector.broadcast %2 : vector<1x8xf32> to vector<128x8xf32>
    %89 = arith.addf %87, %88 : vector<128x8xf32>
    %cst_74 = arith.constant 1.000000e-01 : f32
    %90 = vector.broadcast %cst_74 : f32 to vector<128x8xf32>
    %91 = arith.mulf %90, %89 : vector<128x8xf32>
    %92 = arith.maximumf %89, %91 : vector<128x8xf32>
    %c0_75 = arith.constant 0 : index
    %c0_76 = arith.constant 0 : index
    %c0_77 = arith.constant 0 : index
    %93 = vector.load %arg2[%c0_75, %c0_76, %c0_77] : memref<1x128x8xbf16, #tpu.memory_space<vmem>>, vector<1x128x8xbf16>
    %94 = vector.shape_cast %93 : vector<1x128x8xbf16> to vector<128x8xbf16>
    %95 = arith.extf %94 : vector<128x8xbf16> to vector<128x8xf32>
    %96 = arith.addf %95, %92 : vector<128x8xf32>
    %97 = arith.truncf %96 : vector<128x8xf32> to vector<128x8xbf16>
    %c0_78 = arith.constant 0 : index
    %c0_79 = arith.constant 0 : index
    %c0_80 = arith.constant 0 : index
    %98 = vector.load %arg8[%c0_78, %c0_79, %c0_80] : memref<1x128x8xbf16, #tpu.memory_space<vmem>>, vector<1x128x8xbf16>
    %99 = vector.shape_cast %98 : vector<1x128x8xbf16> to vector<128x8xbf16>
    %100 = vector.shape_cast %97 : vector<128x8xbf16> to vector<1x128x8xbf16>
    tpu.vector_store %arg8[%c0_78, %c0_79, %c0_80], %100 {strides = array<i32>} : memref<1x128x8xbf16, #tpu.memory_space<vmem>>, vector<1x128x8xbf16>,
    return
  }
  func.func @transform_0(%arg0: i32, %arg1: i32) -> (i32, i32, i32) {
    %c0_i32 = arith.constant 0 : i32
    %c0_i32_0 = arith.constant 0 : i32
    return %arg0, %arg1, %c0_i32 : i32, i32, i32
  }
  func.func @transform_1(%arg0: i32, %arg1: i32) -> (i32, i32, i32, i32) {
    %c0_i32 = arith.constant 0 : i32
    %c0_i32_0 = arith.constant 0 : i32
    %c0_i32_1 = arith.constant 0 : i32
    return %arg0, %arg1, %c0_i32, %c0_i32_0 : i32, i32, i32, i32
  }
  func.func @transform_2(%arg0: i32, %arg1: i32) -> (i32, i32) {
    %c0_i32 = arith.constant 0 : i32
    %c0_i32_0 = arith.constant 0 : i32
    %c0_i32_1 = arith.constant 0 : i32
    return %c0_i32, %c0_i32_0 : i32, i32
  }
  func.func @transform_3(%arg0: i32, %arg1: i32) -> (i32, i32) {
    %c0_i32 = arith.constant 0 : i32
    %c0_i32_0 = arith.constant 0 : i32
    %c0_i32_1 = arith.constant 0 : i32
    return %c0_i32, %c0_i32_0 : i32, i32
  }
  func.func @transform_4(%arg0: i32, %arg1: i32) -> (i32, i32) {
    %c0_i32 = arith.constant 0 : i32
    %c0_i32_0 = arith.constant 0 : i32
    %c0_i32_1 = arith.constant 0 : i32
    return %c0_i32, %c0_i32_0 : i32, i32
  }
  func.func @transform_5(%arg0: i32, %arg1: i32) -> (i32, i32) {
    %c0_i32 = arith.constant 0 : i32
    %c0_i32_0 = arith.constant 0 : i32
    %c0_i32_1 = arith.constant 0 : i32
    return %c0_i32, %c0_i32_0 : i32, i32
  }
  func.func @transform_6(%arg0: i32, %arg1: i32) -> (i32, i32, i32) {
    %c0_i32 = arith.constant 0 : i32
    %c0_i32_0 = arith.constant 0 : i32
    return %arg0, %arg1, %c0_i32 : i32, i32, i32
  }
}

</mosaic_0001>

<bundles_post_ra>
// kernel: tpu_custom_call.1
= control target key start
LH: loop header
LB: loop body
LE: loop exit
PB: predicated region body
PF: predicated region fallthrough
CT: control target
= control target key end

     0   :  { %s3647_s21 = smov 0   ;;  %s3649_s22 = smov 0   ;;  %s4764_s0 = inlined_call_operand.vmem [shape: bf16[2,256,8], index: 0, kind: input, shape index: {}]   ;;  %s4765_s1 = inlined_call_operand.vmem [shape: bf16[2,2,32,8], index: 1, kind: input, shape index: {}]   ;;  %s4766_s2 = inlined_call_operand.vmem [shape: bf16[8,4], index: 2, kind: input, shape index: {}]   ;;  %s4767_s3 = inlined_call_operand.vmem [shape: f32[1,4], index: 3, kind: input, shape index: {}]   ;;  %s4768_s4 = inlined_call_operand.vmem [shape: bf16[36,8], index: 4, kind: input, shape index: {}]   ;;  %s4769_s5 = inlined_call_operand.vmem [shape: f32[1,8], index: 5, kind: input, shape index: {}]   ;;  %s4770_s6 = inlined_call_operand.vmem [shape: bf16[2,256,8], index: 6, kind: output, shape index: {}]  }
   0x1   :  { %s3651_s23 = smov 0   ;;  %s3653_s24 = smov 0  }
   0x2   :  { %s3655_s25 = smov 0  }
   0x3 LB: > { %s25_s26 = sadd.s32 1, %s3602_s23  ;;  %s28_s27 = sadd.s32 1, %s3606_s24  ;;  %s3610_s25 = sphi %s3655_s25, %s16_s25   ;;  %s3606_s24 = sphi %s3653_s24, %s4786_s24   ;;  %s3602_s23 = sphi %s3651_s23, %s4785_s23   ;;  %s3598_s22 = sphi %s3649_s22, %s4784_s22   ;;  %s3594_s21 = sphi %s3647_s21, %s4783_s21  }
   0x4   : > { %p26_p0 = scmp.ge.s32.totalorder %s25_s26, 2  ;;  %p3196_p1 = scmp.ge.s32.totalorder %s3610_s25, 1 }
   0x5   : > { %p249_p2 = scmp.lt.s32.totalorder %s3610_s25, 5 }
   0x6   : > { %s4788_s26 = smov (%p26_p0, %s25_s26), 0  ;;  %s4790_s27 = smov (!%p26_p0, %s28_s27), %s3606_s24 }
   0x7   : > { %p250_p3 = pnand %p3196_p1, %p249_p2  ;;  %p30_p4 = scmp.ge.s32.totalorder %s4790_s27, 2 }
   0x8   : > { %s3197_s30 = sshll.u32 (!%p250_p3), %s3594_s21, 4  ;;  %p297_p5 = scmp.lt.s32.totalorder (!%p250_p3), %s3598_s22, 1 }
   0x9   : > { %s4792_s27 = smov (%p30_p4, %s4790_s27), 0  ;;  %253 = sbr.rel (%p250_p3) target bundleno = 702 (0x2be), region = 44 }
   0xa   : > { %p299_p6 = scmp.lt.s32.totalorder (!%p250_p3), %s3197_s30, 31  ;;  %p308_p7 = scmp.lt.s32.totalorder (!%p250_p3), %s3594_s21, 1 }
   0xb   : > { %p787_p8 = scmp.gt.s32.totalorder (!%p250_p3), %s3594_s21, 0 }
   0xe   : > { %v326_v0 = vld [vmem:[%s4766_s2] sm:$0xf]  ;;  %vm413_vm0 = vcmask 1043456   ;;  %s4794_s22 = smov (!%p297_p5, %s3598_s22), 1  ;;  %s4796_s30 = smov (!%p299_p6, %s3197_s30), 31  ;;  %vm388_vm1 = vcmask 64512  }
   0xf   : > { %v415_v1 = vsel %vm413_vm0, %v326_v0, 0  ;;  %s3198_s7 = sshll.u32 %s4794_s22, 5  ;;  %s3201_s13 = sshll.u32 %s4794_s22, 3  ;;  %v3723_v11 = vld [vmem:[%s4767_s3] ss:$0 sm:$0xff]  ;;  %vm1193_vm2 = vcmask 1041408  }
  0x10   : > { %424 = vmatpush.bf16.msra.mxu0 %v415_v1  ;;  %767 = vmatpush.bf16.msra.mxu1 %v415_v1  ;;  %s3684_s8 = sadd.s32 %s3198_s7, %s4796_s30  ;;  %v1578_v13 = vld [vmem:[%s4768_s4 + $0x4] sm:$0xc]  ;;  %vm678_vm3 = vcmask 27648   ;;  %v935_v25 = vld [vmem:[%s4768_s4] sm:$0x3]  ;;  %vm686_vm7 = vcmask 24576  }
  0x11   : > { %3523 = vmatpush.bf16.msra.mxu3 %v415_v1  ;;  %s3199_s9 = sshll.u32 %s3684_s8, 2  ;;  %v1620_v15 = vunpack.c.l.b16 %v1578_v13  ;;  %vm679_vm4 = vsmask.f32 7938  ;;  %v1311_v30 = vsel %vm1193_vm2, %v935_v25, 0  ;;  %v681_v37 = vld [vmem:[#allocation2 + $0xc] sm:$0xf] }
  0x12   : > { %s3692_s12 = scalar_lea.vmem %s4764_s0, %s3199_s9  ;;  %vm3740_vm5 = vmand %vm678_vm3, %vm679_vm4  ;;  %vm514_vm6 = vsmask.f32 256  ;;  %vm515_vm8 = vsmask.f32 4368  ;;  %v1139_v52 = vld [vmem:[%s4768_s4] sm:$0xc] }
  0x13   : > { %v3450_v2 = vld [vmem:[%s3692_s12] sm:$0xff]  ;;  %s309_s14 = scalar_select %p308_p7, %s3594_s21, 1  ;;  %v3451_v4 = vld [vmem:[%s3692_s12 + $0x8] sm:$0xff]  ;;  %v3452_v6 = vld [vmem:[%s3692_s12 + $0x10] sm:$0xff]  ;;  %v1621_v17 = vpack.c.b16 %v1620_v15, %v1620_v15  ;;  %v1165_v57 = vunpack.c.l.b16 %v1139_v52  ;;  %vm1168_vm12 = vcmask 31744   ;;  %vm1386_vm0 = vcmask 1042432  }
  0x14   : > { %3238 = vmatmul.msk.bf16.vlgmr.msra.gmra.mxu0 %vm388_vm1, %v3450_v2  ;;  %v3455_v5 = vld [vmem:[%s3692_s12 + $0x28] sm:$0xff]  ;;  %v3456_v7 = vld [vmem:[%s3692_s12 + $0x30] sm:$0xff]  ;;  %v3453_v8 = vld [vmem:[%s3692_s12 + $0x18] sm:$0xff]  ;;  %s788_s7 = scalar_select %p787_p8, 1, 0 }
  0x15   : > { %s3200_s15 = sshll.u32 %s309_s14, 2  ;;  %3243 = vmatmul.msk.bf16.vlgmr.msra.gmra.mxu3 %vm388_vm1, %v3455_v5  ;;  %v3457_v9 = vld [vmem:[%s3692_s12 + $0x38] sm:$0xff]  ;;  %v3454_v10 = vld [vmem:[%s3692_s12 + $0x20] sm:$0xff]  ;;  %v1622_v19 = vrot.slane %v1621_v17, 2  ;;  %vm3754_vm9 = vmand %vm686_vm7, %vm514_vm6  ;;  %v1166_v5 = vpack.c.b16 %v1165_v57, %v1165_v57  ;;  %vm944_vm13 = vsmask.f32 3328 }
  0x16   : > { %s312_s16 = sadd.s32 %s3201_s13, %s3200_s15  ;;  %s789_s10 = scvt.s32.f32 %s788_s7  ;;  %1320 = vmatpush.bf16.msrb.mxu3 %v1311_v30  ;;  %v818_v58 = vld [vmem:[#allocation2] sm:$0xf]  ;;  %vm3759_vm10 = vmor %vm514_vm6, %vm515_vm8  ;;  %v688_v60 = vld [vmem:[#allocation2 + $0x14] sm:$0x1]  ;;  %vm945_vm14 = vsmask.f32 7440 }
  0x17   : > { %s3202_s17 = sshll.u32 %s312_s16, 2  ;;  %v1648_v23 = vsel %vm1193_vm2, %v1622_v19, 0  ;;  %v1167_v15 = vrot.slane %v1166_v5, 2  ;;  %vm3776_vm11 = vmand %vm686_vm7, %vm679_vm4 }
  0x18   : > { %s3702_s20 = scalar_lea.vmem %s4765_s1, %s3202_s17  ;;  %1657 = vmatpush.bf16.msrb.mxu0 %v1648_v23  ;;  %v793_v29 = vstv %s789_s10  ;;  %vm3820_vm15 = vmor %vm944_vm13, %vm945_vm14 }
  0x19   : > { %v3458_v3 = vld [vmem:[%s3702_s20] sm:$0xff]  ;;  %v3459_v35 = vld [vmem:[%s3702_s20 + $0x8] sm:$0xff]  ;;  %s4097_s30 = scalar_select %p308_p7, 1, 0 }
  0x1a   : > { %3254 = vmatmul.msk.bf16.vlgmr.msra.gmra.mxu1 %vm388_vm1, %v3458_v3  ;;  %s4680_s20 = scalar_lea.vmem %s4770_s6, %s3199_s9 }
  0x1b   : > { %s792_s10 = scvt.s32.f32 %s4097_s30 }
  0x24   : > { %3239 = vmatmul.msk.bf16.gmra.mxu0 %vm388_vm1, %v3451_v4 }
  0x25   : > { %3244 = vmatmul.msk.bf16.gmra.mxu3 %vm388_vm1, %v3456_v7 }
  0x2a   : > { %3255 = vmatmul.msk.bf16.gmra.mxu1 %vm388_vm1, %v3459_v35 }
  0x34   : > { %3240 = vmatmul.msk.bf16.gmra.mxu0 %vm388_vm1, %v3452_v6 }
  0x35   : > { %3245 = vmatmul.msk.bf16.gmra.mxu3 %vm388_vm1, %v3457_v9 }
  0x44   : > { %3241 = vmatmul.msk.bf16.gmra.mxu0 %vm388_vm1, %v3453_v8 }
  0x54   : > { %3242 = vmatmul.msk.bf16.gmra.mxu0 %vm388_vm1, %v3454_v10  ;;  %vm1387_vm1 = vcmask 1046532  }
  0x55   : > { %vm4008_vm4 = vmor %vm1386_vm0, %vm1387_vm1 }
  0x91   : > { %v426_v12 = vpop.f32.mrf.mxu0 }
  0x92   : > { %v427_v14 = vadd.f32 %v3723_v11, %v426_v12 }
  0x94   : > { %v466_v16 = vmul.f32 0.1, %v427_v14 }
  0x96   : > { %v482_v18 = vmax.f32 %v427_v14, %v466_v16 }
  0x97   : > { %v769_v20 = vpop.f32.mrf.mxu1 }
  0x98   : > { %v498_v21 = vpack.c.bf16 %v482_v18, %v482_v18  ;;  %v770_v22 = vadd.f32 %v3723_v11, %v769_v20 }
  0x99   : > { %v428_v24 = vpop.f32.mrf.mxu0 }
  0x9a   : > { %v518_v26 = vshrl.u32 %v498_v21, 16  ;;  %v779_v27 = vmul.f32 0.1, %v770_v22  ;;  %v429_v28 = vadd.f32 %v3723_v11, %v428_v24  ;;  %v521_v32 = vshll.u32 %v498_v21, 16 }
  0x9b   : > { %v1195_v21 = vsel %vm1193_vm2, %v1167_v15, 0 }
  0x9c   : > { %v520_v31 = vrot.slane %v518_v26, 7  ;;  %v783_v33 = vmax.f32 %v770_v22, %v779_v27  ;;  %v467_v34 = vmul.f32 0.1, %v429_v28  ;;  %1204 = vmatpush.bf16.msrb.mxu1 %v1195_v21  ;;  %3524 = vmatpush.bf16.msra.mxu2 %v1195_v21  ;;  %v822_v26 = vld [vmem:[#allocation2 + $0x8] sm:$0x1] }
  0x9e   : > { %v523_v38 = vor.u32 %v521_v32, %v520_v31  ;;  %v794_v39 = vmul.f32 %v793_v29, %v783_v33  ;;  %v483_v40 = vmax.f32 %v429_v28, %v467_v34  ;;  %v524_v63 = vrot.slane %v520_v31, 4  ;;  %v691_v32 = vld [vmem:[#allocation2 + $0x18] sm:$0xf] }
  0x9f   : > { %v771_v41 = vpop.f32.mrf.mxu1 }
  0xa0   : > { %v682_v42 = vsel %vm3740_vm5, %v523_v38, %v681_v37  ;;  %v796_v43 = vpack.c.bf16 %v794_v39, %v794_v39  ;;  %v499_v44 = vpack.c.bf16 %v483_v40, %v483_v40  ;;  %v772_v45 = vadd.f32 %v3723_v11, %v771_v41 }
  0xa1   : > { %683 = vst [vmem:[#allocation2 + $0xc] sm:$0xf] %v682_v42  ;;  %v431_v46 = vpop.f32.mrf.mxu0 }
  0xa2   : > { %v799_v47 = vshrl.u32 %v796_v43, 16  ;;  %v802_v48 = vshll.u32 %v796_v43, 16  ;;  %v526_v49 = vshrl.u32 %v499_v44, 16  ;;  %v780_v50 = vmul.f32 0.1, %v772_v45 }
  0xa3   : > { %v432_v51 = vadd.f32 %v3723_v11, %v431_v46  ;;  %v529_v56 = vshll.u32 %v499_v44, 16 }
  0xa4   : > { %v801_v54 = vrot.slane %v799_v47, 7  ;;  %v528_v55 = vrot.slane %v526_v49, 7  ;;  %v784_v61 = vmax.f32 %v772_v45, %v780_v50  ;;  %v695_v47 = vld [vmem:[#allocation2 + $0x20] sm:$0x1] }
  0xa5   : > { %v468_v62 = vmul.f32 0.1, %v432_v51 }
  0xa6   : > { %v804_v0 = vor.u32 %v802_v48, %v801_v54  ;;  %v531_v1 = vor.u32 %v529_v56, %v528_v55  ;;  %v533_v2 = vrot.slane %v528_v55, 4  ;;  %v795_v3 = vmul.f32 %v793_v29, %v784_v61 }
  0xa7   : > { %v484_v4 = vmax.f32 %v432_v51, %v468_v62  ;;  %v805_v22 = vrot.slane %v801_v54, 4  ;;  %v451_v54 = vpop.f32.mrf.mxu3 }
  0xa8   : > { %v861_v6 = vld [vmem:[#allocation2 + $0xc] sm:$0x1]  ;;  %v819_v7 = vsel %vm3740_vm5, %v804_v0, %v818_v58  ;;  %v532_v8 = vsel %vm3759_vm10, %v524_v63, %v531_v1  ;;  %v689_v9 = vsel %vm3754_vm9, %v533_v2, %v688_v60  ;;  %v797_v12 = vpack.c.bf16 %v795_v3, %v795_v3 }
  0xa9   : > { %v862_v10 = vsel %vm3754_vm9, 0, %v861_v6  ;;  %820 = vst [vmem:[#allocation2] sm:$0xf] %v819_v7  ;;  %v500_v13 = vpack.c.bf16 %v484_v4, %v484_v4  ;;  %v433_v14 = vpop.f32.mrf.mxu0 }
  0xaa   : > { %863 = vst [vmem:[#allocation2 + $0xc] sm:$0x1] %v862_v10  ;;  %v434_v16 = vadd.f32 %v3723_v11, %v433_v14  ;;  %v807_v17 = vshrl.u32 %v797_v12, 16  ;;  %v810_v18 = vshll.u32 %v797_v12, 16 }
  0xab   : > { %685 = vst.msk [vmem:[#allocation2 + $0x10] sm:$0xf] %vm678_vm3, %v532_v8  ;;  %v535_v19 = vshrl.u32 %v500_v13, 16  ;;  %v538_v25 = vshll.u32 %v500_v13, 16 }
  0xac   : > { %690 = vst [vmem:[#allocation2 + $0x14] sm:$0x1] %v689_v9  ;;  %v469_v20 = vmul.f32 0.1, %v434_v16  ;;  %v809_v23 = vrot.slane %v807_v17, 7 }
  0xad   : > { %v537_v24 = vrot.slane %v535_v19, 7  ;;  %v452_v19 = vadd.f32 %v3723_v11, %v451_v54 }
  0xae   : > { %v485_v27 = vmax.f32 %v434_v16, %v469_v20  ;;  %v812_v28 = vor.u32 %v810_v18, %v809_v23  ;;  %v814_v29 = vrot.slane %v809_v23, 4  ;;  %v698_v16 = vld [vmem:[#allocation2 + $0x24] sm:$0xf] }
  0xaf   : > { %v540_v30 = vor.u32 %v538_v25, %v537_v24  ;;  %v541_v52 = vrot.slane %v537_v24, 4 }
  0xb0   : > { %v858_v31 = vld [vmem:[#allocation2] sm:$0x1]  ;;  %v501_v33 = vpack.c.bf16 %v485_v27, %v485_v27  ;;  %v813_v37 = vsel %vm3759_vm10, %v805_v22, %v812_v28  ;;  %v823_v38 = vsel %vm3754_vm9, %v814_v29, %v822_v26  ;;  %v453_v27 = vpop.f32.mrf.mxu3 }
  0xb1   : > { %v859_v35 = vsel %vm3754_vm9, 0, %v858_v31  ;;  %v436_v39 = vpop.f32.mrf.mxu0  ;;  %v921_v40 = vld [vmem:[#allocation2 + $0xc] sm:$0xf]  ;;  %821 = vst.msk [vmem:[#allocation2 + $0x4] sm:$0xf] %vm678_vm3, %v813_v37  ;;  %v692_v46 = vsel %vm3740_vm5, %v540_v30, %v691_v32 }
  0xb2   : > { %860 = vst [vmem:[#allocation2] sm:$0x1] %v859_v35  ;;  %v543_v41 = vshrl.u32 %v501_v33, 16  ;;  %v546_v42 = vshll.u32 %v501_v33, 16  ;;  %v437_v43 = vadd.f32 %v3723_v11, %v436_v39  ;;  %v3468_v44 = vld [vmem:[#allocation2 + $0xc] sm:$0xff]  ;;  %v972_v55 = vshrl.u32 %v921_v40, 16 }
  0xb3   : > { %v892_v45 = vld [vmem:[#allocation2 + $0x14] sm:$0x1]  ;;  %v3790_v48 = vld [vmem:[#allocation2 + $0x10] sm:$0xf]  ;;  %824 = vst [vmem:[#allocation2 + $0x8] sm:$0x1] %v823_v38  ;;  %3352 = vmatmul.msk.bf16.vlgmr.msrb.gmra.mxu0 %vm1168_vm12, %v3468_v44 }
  0xb4   : > { %v893_v49 = vsel %vm3776_vm11, 0, %v892_v45  ;;  %v545_v50 = vrot.slane %v543_v41, 7  ;;  %v470_v51 = vmul.f32 0.1, %v437_v43  ;;  %v975_v56 = vshll.u32 %v921_v40, 16 }
  0xb5   : > { %894 = vst [vmem:[#allocation2 + $0x14] sm:$0x1] %v893_v49  ;;  %v981_v61 = vshll.u32 %v3790_v48, 16  ;;  %v974_v62 = vrot.slane %v972_v55, 4  ;;  %v985_v0 = vshrl.u32 %v3790_v48, 16  ;;  %v454_v41 = vadd.f32 %v3723_v11, %v453_v27 }
  0xb6   : > { %693 = vst [vmem:[#allocation2 + $0x18] sm:$0xf] %v692_v46  ;;  %v548_v57 = vor.u32 %v546_v42, %v545_v50  ;;  %v550_v58 = vrot.slane %v545_v50, 4  ;;  %v486_v60 = vmax.f32 %v437_v43, %v470_v51  ;;  %v977_v63 = vrot.slane %v975_v56, 5 }
  0xb7   : > { %v3802_v7 = vrot.slane %v981_v61, 5  ;;  %v3805_v13 = vrot.slane %v985_v0, 4  ;;  %v476_v38 = vmul.f32 0.1, %v452_v19 }
  0xb8   : > { %v549_v1 = vsel %vm3759_vm10, %v541_v52, %v548_v57  ;;  %v696_v2 = vsel %vm3754_vm9, %v550_v58, %v695_v47  ;;  %v502_v3 = vpack.c.bf16 %v486_v60, %v486_v60  ;;  %v978_v6 = vor.u32 %v977_v63, %v974_v62  ;;  %v3807_v17 = vld [vmem:[#allocation2 + $0x4] sm:$0xf] }
  0xb9   : > { %694 = vst.msk [vmem:[#allocation2 + $0x1c] sm:$0xf] %vm678_vm3, %v549_v1  ;;  %v438_v4 = vpop.f32.mrf.mxu0  ;;  %v919_v5 = vld [vmem:[#allocation2] sm:$0xf]  ;;  %v957_v26 = vshll.u32 %v3807_v17, 16  ;;  %v961_v37 = vshrl.u32 %v3807_v17, 16  ;;  %v492_v47 = vmax.f32 %v452_v19, %v476_v38  ;;  %v988_v49 = vor.u32 %v3805_v13, %v3802_v7 }
  0xba   : > { %697 = vst [vmem:[#allocation2 + $0x20] sm:$0x1] %v696_v2  ;;  %v552_v8 = vshrl.u32 %v502_v3, 16  ;;  %v3460_v9 = vld [vmem:[#allocation2] sm:$0xff]  ;;  %v439_v10 = vadd.f32 %v3723_v11, %v438_v4  ;;  %v948_v12 = vshrl.u32 %v919_v5, 16  ;;  %v555_v15 = vshll.u32 %v502_v3, 16 }
  0xbb   : > { %v889_v14 = vld [vmem:[#allocation2 + $0x8] sm:$0x1]  ;;  %v951_v18 = vshll.u32 %v919_v5, 16  ;;  %3296 = vmatmul.msk.bf16.vlgmr.msrb.gmra.mxu3 %vm1168_vm12, %v3460_v9  ;;  %v3816_v31 = vrot.slane %v978_v6, 4  ;;  %v959_v35 = vrot.slane %v957_v26, 5  ;;  %v963_v46 = vrot.slane %v961_v37, 4 }
  0xbc   : > { %v890_v20 = vsel %vm3776_vm11, 0, %v889_v14  ;;  %v554_v21 = vrot.slane %v552_v8, 7  ;;  %v471_v22 = vmul.f32 0.1, %v439_v10  ;;  %v950_v23 = vrot.slane %v948_v12, 4 }
  0xbd   : > { %891 = vst [vmem:[#allocation2 + $0x8] sm:$0x1] %v890_v20  ;;  %v864_v24 = vld [vmem:[#allocation2 + $0x18] sm:$0x1]  ;;  %v953_v25 = vrot.slane %v951_v18, 5  ;;  %v984_v54 = vsel %vm3820_vm15, %v3816_v31, %v3802_v7  ;;  %v964_v56 = vor.u32 %v963_v46, %v959_v35  ;;  %v508_v57 = vpack.c.bf16 %v492_v47, %v492_v47 }
  0xbe   : > { %v865_v28 = vsel %vm3754_vm9, 0, %v864_v24  ;;  %v557_v29 = vor.u32 %v555_v15, %v554_v21  ;;  %v487_v30 = vmax.f32 %v439_v10, %v471_v22  ;;  %v3828_v42 = vld [vmem:[#allocation2 + $0x14] sm:$0x1]  ;;  %v477_v58 = vmul.f32 0.1, %v454_v41 }
  0xbf   : > { %866 = vst [vmem:[#allocation2 + $0x18] sm:$0x1] %v865_v28  ;;  %v954_v33 = vor.u32 %v953_v25, %v950_v23  ;;  %v991_v0 = vshll.u32 %v3828_v42, 16  ;;  %v558_v1 = vrot.slane %v554_v21, 4  ;;  %v702_v2 = vld [vmem:[#allocation2 + $0x2c] sm:$0x1] }
  0xc0   : > { %v699_v39 = vsel %vm3740_vm5, %v557_v29, %v698_v16  ;;  %v503_v40 = vpack.c.bf16 %v487_v30, %v487_v30  ;;  %v965_v3 = vrot.slane %v964_v56, 4  ;;  %v603_v5 = vshrl.u32 %v508_v57, 16  ;;  %v719_v22 = vld [vmem:[#allocation2 + $0x48] sm:$0xf]  ;;  %v456_v29 = vpop.f32.mrf.mxu3 }
  0xc1   : > { %v895_v43 = vld [vmem:[#allocation2 + $0x20] sm:$0x1]  ;;  %700 = vst [vmem:[#allocation2 + $0x24] sm:$0xf] %v699_v39  ;;  %v441_v44 = vpop.f32.mrf.mxu0  ;;  %v955_v45 = vrot.slane %v954_v33, 4  ;;  %v606_v10 = vshll.u32 %v508_v57, 16  ;;  %v493_v15 = vmax.f32 %v454_v41, %v477_v58 }
  0xc2   : > { %v896_v50 = vsel %vm3776_vm11, 0, %v895_v43  ;;  %v560_v51 = vshrl.u32 %v503_v40, 16  ;;  %v442_v52 = vadd.f32 %v3723_v11, %v441_v44  ;;  %v563_v55 = vshll.u32 %v503_v40, 16  ;;  %v3461_v33 = vld [vmem:[#allocation2 + $0xc] sm:$0xff] }
  0xc3   : > { %897 = vst [vmem:[#allocation2 + $0x20] sm:$0x1] %v896_v50  ;;  %v960_v63 = vsel %vm3820_vm15, %v955_v45, %v959_v35  ;;  %v3845_v14 = vrot.slane %v603_v5, 7  ;;  %v993_v23 = vrot.slane %v991_v0, 5  ;;  %v989_v28 = vrot.slane %v988_v49, 4 }
  0xc4   : > { %v562_v60 = vrot.slane %v560_v51, 7  ;;  %v472_v61 = vmul.f32 0.1, %v442_v52  ;;  %v3839_v62 = vld [vmem:[#allocation2 + $0x8] sm:$0x1]  ;;  %v1140_v13 = vunpack.c.l.b16 %v960_v63  ;;  %v509_v41 = vpack.c.bf16 %v493_v15, %v493_v15 }
  0xc5   : > { %v967_v4 = vshll.u32 %v3839_v62, 16  ;;  %v608_v27 = vor.u32 %v606_v10, %v3845_v14  ;;  %v705_v39 = vld [vmem:[#allocation2 + $0x30] sm:$0xf]  ;;  %v994_v46 = vsel %vm3820_vm15, %v989_v28, %v993_v23  ;;  %v3866_v50 = vunpack.c.l.b16 %v984_v54  ;;  %v3868_v51 = vld [vmem:[#allocation2 + $0x1c] sm:$0xf] }
  0xc6   : > { %v565_v6 = vor.u32 %v563_v55, %v562_v60  ;;  %v567_v7 = vrot.slane %v562_v60, 4  ;;  %v488_v8 = vmax.f32 %v442_v52, %v472_v61  ;;  %v3469_v9 = vld [vmem:[#allocation2 + $0x18] sm:$0xff]  ;;  %v611_v47 = vshrl.u32 %v509_v41, 16 }
  0xc7   : > { %v969_v12 = vrot.slane %v967_v4, 5  ;;  %v923_v16 = vld [vmem:[#allocation2 + $0x18] sm:$0xf]  ;;  %3353 = vmatmul.msk.bf16.gmra.mxu0 %vm1168_vm12, %v3469_v9  ;;  %v720_v40 = vsel %vm3740_vm5, %v608_v27, %v719_v22  ;;  %v614_v49 = vshll.u32 %v509_v41, 16  ;;  %v609_v57 = vrot.slane %v3845_v14, 4 }
  0xc8   : > { %v867_v18 = vld [vmem:[#allocation2 + $0x24] sm:$0x1]  ;;  %v566_v19 = vsel %vm3759_vm10, %v558_v1, %v565_v6  ;;  %v703_v20 = vsel %vm3754_vm9, %v567_v7, %v702_v2  ;;  %v504_v21 = vpack.c.bf16 %v488_v8, %v488_v8  ;;  %v996_v37 = vshrl.u32 %v923_v16, 16  ;;  %721 = vst [vmem:[#allocation2 + $0x48] sm:$0xf] %v720_v40 }
  0xc9   : > { %v868_v24 = vsel %vm3754_vm9, 0, %v867_v18  ;;  %701 = vst.msk [vmem:[#allocation2 + $0x28] sm:$0xf] %vm678_vm3, %v566_v19  ;;  %v970_v25 = vsel %vm3820_vm15, %v965_v3, %v969_v12  ;;  %v443_v26 = vpop.f32.mrf.mxu0  ;;  %v999_v52 = vshll.u32 %v923_v16, 16  ;;  %v613_v60 = vrot.slane %v611_v47, 7  ;;  %v458_v18 = vpop.f32.mrf.mxu3 }
  0xca   : > { %869 = vst [vmem:[#allocation2 + $0x24] sm:$0x1] %v868_v24  ;;  %v569_v30 = vshrl.u32 %v504_v21, 16  ;;  %v1141_v31 = vunpack.c.l.b16 %v970_v25  ;;  %v444_v35 = vadd.f32 %v3723_v11, %v443_v26  ;;  %v572_v38 = vshll.u32 %v504_v21, 16  ;;  %v3878_v0 = vld [vmem:[#allocation2 + $0x20] sm:$0x1] }
  0xcb   : > { %704 = vst [vmem:[#allocation2 + $0x2c] sm:$0x1] %v703_v20  ;;  %3297 = vmatmul.msk.bf16.gmra.mxu3 %vm1168_vm12, %v3461_v33  ;;  %v3873_v58 = vrot.slane %v996_v37, 4  ;;  %v3875_v61 = vunpack.c.l.b16 %v994_v46  ;;  %v457_v63 = vadd.f32 %v3723_v11, %v456_v29  ;;  %v3880_v54 = vrot.slane %v999_v52, 5  ;;  %v723_v4 = vld [vmem:[#allocation2 + $0x50] sm:$0x1] }
  0xcc   : > { %v3861_v43 = vrot.slane %v569_v30, 7  ;;  %v1156_v44 = vpack.c.b16 %v1141_v31, %v1140_v13  ;;  %v473_v45 = vmul.f32 0.1, %v444_v35  ;;  %v1005_v5 = vshll.u32 %v3868_v51, 16  ;;  %v709_v31 = vld [vmem:[#allocation2 + $0x38] sm:$0x1] }
  0xcd   : > { %v616_v7 = vor.u32 %v614_v49, %v613_v60  ;;  %v618_v8 = vrot.slane %v613_v60, 4  ;;  %v478_v9 = vmul.f32 0.1, %v457_v63  ;;  %v1009_v12 = vshrl.u32 %v3868_v51, 16  ;;  %v726_v60 = vld [vmem:[#allocation2 + $0x54] sm:$0xf] }
  0xce   : > { %v574_v55 = vor.u32 %v572_v38, %v3861_v43  ;;  %3256 = vmatmul.msk.bf16.vlgmr.msrb.gmra.mxu1 %vm1168_vm12, %v1156_v44  ;;  %v489_v56 = vmax.f32 %v444_v35, %v473_v45  ;;  %v575_v1 = vrot.slane %v3861_v43, 4  ;;  %v1002_v19 = vor.u32 %v3880_v54, %v3873_v58  ;;  %v1931_v44 = vld [vmem:[%s4768_s4 + $0x8] sm:$0x3] }
  0xcf   : > { %v1015_v20 = vshll.u32 %v3878_v0, 16  ;;  %v876_v23 = vld [vmem:[#allocation2 + $0x48] sm:$0x1]  ;;  %v617_v24 = vsel %vm3759_vm10, %v609_v57, %v616_v7  ;;  %v494_v26 = vmax.f32 %v457_v63, %v478_v9  ;;  %v724_v30 = vsel %vm3754_vm9, %v618_v8, %v723_v4  ;;  %v3462_v9 = vld [vmem:[#allocation2 + $0x18] sm:$0xff] }
  0xd0   : > { %v706_v2 = vsel %vm3740_vm5, %v574_v55, %v705_v39  ;;  %v505_v3 = vpack.c.bf16 %v489_v56, %v489_v56  ;;  %v3886_v10 = vld [vmem:[#allocation2 + $0x28] sm:$0xf]  ;;  %v877_v28 = vsel %vm3754_vm9, 0, %v876_v23  ;;  %v459_v38 = vadd.f32 %v3723_v11, %v458_v18  ;;  %722 = vst.msk [vmem:[#allocation2 + $0x4c] sm:$0xf] %vm678_vm3, %v617_v24 }
  0xd1   : > { %707 = vst [vmem:[#allocation2 + $0x30] sm:$0xf] %v706_v2  ;;  %v446_v6 = vpop.f32.mrf.mxu0  ;;  %v925_v16 = vld [vmem:[#allocation2 + $0x24] sm:$0xf]  ;;  %v510_v33 = vpack.c.bf16 %v494_v26, %v494_v26  ;;  %v1029_v43 = vshll.u32 %v3886_v10, 16  ;;  %v1033_v7 = vshrl.u32 %v3886_v10, 16 }
  0xd2   : > { %v898_v13 = vld [vmem:[#allocation2 + $0x2c] sm:$0x1]  ;;  %v577_v14 = vshrl.u32 %v505_v3, 16  ;;  %v447_v15 = vadd.f32 %v3723_v11, %v446_v6  ;;  %v580_v22 = vshll.u32 %v505_v3, 16  ;;  %v3470_v25 = vld [vmem:[#allocation2 + $0x24] sm:$0xff]  ;;  %v1020_v35 = vshrl.u32 %v925_v16, 16 }
  0xd3   : > { %v899_v21 = vsel %vm3776_vm11, 0, %v898_v13  ;;  %878 = vst [vmem:[#allocation2 + $0x48] sm:$0x1] %v877_v28  ;;  %v1023_v37 = vshll.u32 %v925_v16, 16  ;;  %v620_v45 = vshrl.u32 %v510_v33, 16  ;;  %v623_v46 = vshll.u32 %v510_v33, 16 }
  0xd4   : > { %900 = vst [vmem:[#allocation2 + $0x2c] sm:$0x1] %v899_v21  ;;  %v579_v27 = vrot.slane %v577_v14, 7  ;;  %v474_v29 = vmul.f32 0.1, %v447_v15  ;;  %v1022_v47 = vrot.slane %v1020_v35, 4 }
  0xd5   : > { %725 = vst [vmem:[#allocation2 + $0x50] sm:$0x1] %v724_v30  ;;  %v1025_v49 = vrot.slane %v1023_v37, 5  ;;  %v1031_v63 = vrot.slane %v1029_v43, 5  ;;  %v3915_v4 = vrot.slane %v620_v45, 7  ;;  %v1981_v14 = vsel %vm1193_vm2, %v1931_v44, 0 }
  0xd6   : > { %v582_v39 = vor.u32 %v580_v22, %v579_v27  ;;  %v584_v40 = vrot.slane %v579_v27, 4  ;;  %v490_v41 = vmax.f32 %v447_v15, %v474_v29  ;;  %v1157_v15 = vpack.c.b16 %v3875_v61, %v3866_v50  ;;  %1990 = vmatpush.bf16.msrb.mxu2 %v1981_v14  ;;  %v712_v27 = vld [vmem:[#allocation2 + $0x3c] sm:$0xf]  ;;  %v1445_v37 = vld [vmem:[%s4768_s4 + $0x4] sm:$0x3] }
  0xd7   : > { %3354 = vmatmul.msk.bf16.gmra.mxu0 %vm1168_vm12, %v3470_v25  ;;  %v1026_v6 = vor.u32 %v1025_v49, %v1022_v47  ;;  %v625_v16 = vor.u32 %v623_v46, %v3915_v4  ;;  %v626_v18 = vrot.slane %v3915_v4, 4  ;;  %v1035_v25 = vrot.slane %v1033_v7, 4 }
  0xd8   : > { %v870_v52 = vld [vmem:[#allocation2 + $0x30] sm:$0x1]  ;;  %v583_v55 = vsel %vm3759_vm10, %v575_v1, %v582_v39  ;;  %v710_v56 = vsel %vm3754_vm9, %v584_v40, %v709_v31  ;;  %v506_v57 = vpack.c.bf16 %v490_v41, %v490_v41  ;;  %v479_v28 = vmul.f32 0.1, %v459_v38 }
  0xd9   : > { %v871_v2 = vsel %vm3754_vm9, 0, %v870_v52  ;;  %708 = vst.msk [vmem:[#allocation2 + $0x34] sm:$0xf] %vm678_vm3, %v583_v55  ;;  %v448_v3 = vpop.f32.mrf.mxu0  ;;  %v1027_v22 = vrot.slane %v1026_v6, 4  ;;  %v727_v50 = vsel %vm3740_vm5, %v625_v16, %v726_v60  ;;  %v3937_v29 = vrot.slane %v1002_v19, 4 }
  0xda   : > { %872 = vst [vmem:[#allocation2 + $0x30] sm:$0x1] %v871_v2  ;;  %v586_v1 = vshrl.u32 %v506_v57, 16  ;;  %v589_v8 = vshll.u32 %v506_v57, 16  ;;  %v449_v13 = vadd.f32 %v3723_v11, %v448_v3  ;;  %v1036_v35 = vor.u32 %v1035_v25, %v1031_v63  ;;  %v716_v2 = vld [vmem:[#allocation2 + $0x44] sm:$0x1] }
  0xdb   : > { %711 = vst [vmem:[#allocation2 + $0x38] sm:$0x1] %v710_v56  ;;  %v3924_v21 = vld [vmem:[#allocation2 + $0x2c] sm:$0x1]  ;;  %3298 = vmatmul.msk.bf16.gmra.mxu3 %vm1168_vm12, %v3462_v9  ;;  %v1032_v61 = vsel %vm3820_vm15, %v1027_v22, %v1031_v63  ;;  %v495_v54 = vmax.f32 %v459_v38, %v479_v28  ;;  %v1007_v44 = vrot.slane %v1005_v5, 5  ;;  %v1011_v47 = vrot.slane %v1009_v12, 4 }
  0xdc   : > { %v3926_v23 = vrot.slane %v586_v1, 7  ;;  %v475_v24 = vmul.f32 0.1, %v449_v13  ;;  %v1039_v26 = vshll.u32 %v3924_v21, 16  ;;  %v907_v31 = vld [vmem:[#allocation2 + $0x50] sm:$0x1]  ;;  %v1146_v60 = vunpack.c.l.b16 %v1032_v61 }
  0xdd   : > { %728 = vst [vmem:[#allocation2 + $0x54] sm:$0xf] %v727_v50  ;;  %v908_v40 = vsel %vm3776_vm11, 0, %v907_v31  ;;  %v1037_v43 = vrot.slane %v1036_v35, 4  ;;  %v511_v46 = vpack.c.bf16 %v495_v54, %v495_v54  ;;  %v1017_v49 = vrot.slane %v1015_v20, 5 }
  0xde   : > { %v591_v30 = vor.u32 %v589_v8, %v3926_v23  ;;  %3257 = vmatmul.msk.bf16.gmra.mxu1 %vm1168_vm12, %v1157_v15  ;;  %v491_v33 = vmax.f32 %v449_v13, %v475_v24  ;;  %v592_v39 = vrot.slane %v3926_v23, 4  ;;  %v1041_v58 = vrot.slane %v1039_v26, 5  ;;  %909 = vst [vmem:[#allocation2 + $0x50] sm:$0x1] %v908_v40  ;;  %v461_v13 = vpop.f32.mrf.mxu3 }
  0xdf   : > { %v1495_v38 = vsel %vm1193_vm2, %v1445_v37, 0  ;;  %v628_v12 = vshrl.u32 %v511_v46, 16  ;;  %v631_v6 = vshll.u32 %v511_v46, 16  ;;  %v1008_v1 = vsel %vm3820_vm15, %v3937_v29, %v1007_v44 }
  0xe0   : > { %v713_v19 = vsel %vm3740_vm5, %v591_v30, %v712_v27  ;;  %v507_v41 = vpack.c.bf16 %v491_v33, %v491_v33  ;;  %v3951_v45 = vld [vmem:[#allocation2 + $0x34] sm:$0xf]  ;;  %v1042_v57 = vsel %vm3820_vm15, %v1037_v43, %v1041_v58  ;;  %1504 = vmatpush.bf16.msra.mxu1 %v1495_v38  ;;  %v1012_v8 = vor.u32 %v1011_v47, %v1007_v44  ;;  %v730_v27 = vld [vmem:[#allocation2 + $0x5c] sm:$0x1] }
  0xe1   : > { %714 = vst [vmem:[#allocation2 + $0x3c] sm:$0xf] %v713_v19  ;;  %v927_v5 = vld [vmem:[#allocation2 + $0x30] sm:$0xf]  ;;  %v1147_v3 = vunpack.c.l.b16 %v1042_v57  ;;  %v630_v16 = vrot.slane %v628_v12, 7  ;;  %v1053_v23 = vshll.u32 %v3951_v45, 16  ;;  %v1144_v54 = vunpack.c.l.b16 %v1008_v1 }
  0xe2   : > { %v901_v52 = vld [vmem:[#allocation2 + $0x38] sm:$0x1]  ;;  %v594_v55 = vshrl.u32 %v507_v41, 16  ;;  %v597_v56 = vshll.u32 %v507_v41, 16  ;;  %v3471_v7 = vld [vmem:[#allocation2 + $0x30] sm:$0xff]  ;;  %v1044_v9 = vshrl.u32 %v927_v5, 16  ;;  %v462_v4 = vadd.f32 %v3723_v11, %v461_v13 }
  0xe3   : > { %v902_v63 = vsel %vm3776_vm11, 0, %v901_v52  ;;  %v1159_v15 = vpack.c.b16 %v1147_v3, %v1146_v60  ;;  %v1047_v22 = vshll.u32 %v927_v5, 16  ;;  %v1013_v50 = vrot.slane %v1012_v8, 4  ;;  %v3463_v41 = vld [vmem:[#allocation2 + $0x24] sm:$0xff] }
  0xe4   : > { %903 = vst [vmem:[#allocation2 + $0x38] sm:$0x1] %v902_v63  ;;  %v596_v20 = vrot.slane %v594_v55, 7  ;;  %v879_v14 = vld [vmem:[#allocation2 + $0x54] sm:$0x1]  ;;  %v633_v61 = vor.u32 %v631_v6, %v630_v16  ;;  %v635_v28 = vrot.slane %v630_v16, 4 }
  0xe5   : > { %v880_v26 = vsel %vm3754_vm9, 0, %v879_v14  ;;  %3259 = vmatmul.msk.bf16.vlgmr.msra.gmra.mxu2 %vm1168_vm12, %v1159_v15  ;;  %v1046_v29 = vrot.slane %v1044_v9, 4  ;;  %v1049_v30 = vrot.slane %v1047_v22, 5  ;;  %v1018_v37 = vsel %vm3820_vm15, %v1013_v50, %v1017_v49 }
  0xe6   : > { %v599_v24 = vor.u32 %v597_v56, %v596_v20  ;;  %v601_v25 = vrot.slane %v596_v20, 4  ;;  %881 = vst [vmem:[#allocation2 + $0x54] sm:$0x1] %v880_v26  ;;  %v634_v58 = vsel %vm3759_vm10, %v626_v18, %v633_v61  ;;  %v731_v19 = vsel %vm3754_vm9, %v635_v28, %v730_v27  ;;  %v1362_v56 = vld [vmem:[#allocation2] sm:$0xe]  ;;  %v463_v63 = vpop.f32.mrf.mxu3 }
  0xe7   : > { %3355 = vmatmul.msk.bf16.gmra.mxu0 %vm1168_vm12, %v3471_v7  ;;  %v1050_v43 = vor.u32 %v1049_v30, %v1046_v29  ;;  %v1055_v44 = vrot.slane %v1053_v23, 5  ;;  %v1057_v46 = vshrl.u32 %v3951_v45, 16  ;;  %v1391_v49 = vrot.slane %v3807_v17, 5  ;;  %729 = vst.msk [vmem:[#allocation2 + $0x58] sm:$0xf] %vm678_vm3, %v634_v58 }
  0xe8   : > { %v873_v31 = vld [vmem:[#allocation2 + $0x3c] sm:$0x1]  ;;  %v600_v33 = vsel %vm3759_vm10, %v592_v39, %v599_v24  ;;  %v717_v35 = vsel %vm3754_vm9, %v601_v25, %v716_v2  ;;  %v1145_v39 = vunpack.c.l.b16 %v1018_v37  ;;  %732 = vst [vmem:[#allocation2 + $0x5c] sm:$0x1] %v731_v19  ;;  %v480_v57 = vmul.f32 0.1, %v462_v4 }
  0xe9   : > { %v874_v40 = vsel %vm3754_vm9, 0, %v873_v31  ;;  %715 = vst.msk [vmem:[#allocation2 + $0x40] sm:$0xf] %vm678_vm3, %v600_v33  ;;  %v1051_v38 = vrot.slane %v1050_v43, 4  ;;  %v1059_v52 = vrot.slane %v1057_v46, 4  ;;  %v1394_v3 = vrot.slane %v3839_v62, 5 }
  0xea   : > { %875 = vst [vmem:[#allocation2 + $0x3c] sm:$0x1] %v874_v40  ;;  %v1158_v18 = vpack.c.b16 %v1145_v39, %v1144_v54  ;;  %v496_v2 = vmax.f32 %v462_v4, %v480_v57  ;;  %v3304_v6 = vrot.slane %v1362_v56, 9  ;;  %v1393_v20 = vrot.slane %v1391_v49, 4  ;;  %v733_v40 = vld [vmem:[#allocation2 + $0x60] sm:$0xf] }
  0xeb   : > { %718 = vst [vmem:[#allocation2 + $0x44] sm:$0x1] %v717_v35  ;;  %v3986_v47 = vld [vmem:[#allocation2 + $0x38] sm:$0x1]  ;;  %3299 = vmatmul.msk.bf16.gmra.mxu3 %vm1168_vm12, %v3463_v41  ;;  %v1056_v60 = vsel %vm3820_vm15, %v1051_v38, %v1055_v44  ;;  %v1060_v17 = vor.u32 %v1059_v52, %v1055_v44  ;;  %v464_v14 = vadd.f32 %v3723_v11, %v463_v63  ;;  %v4022_v56 = vld [vmem:[#allocation2 + $0x4c] sm:$0xf] }
  0xec   : > { %v1063_v55 = vshll.u32 %v3986_v47, 16  ;;  %v1148_v1 = vunpack.c.l.b16 %v1056_v60  ;;  %v512_v8 = vpack.c.bf16 %v496_v2, %v496_v2  ;;  %v1392_v28 = vsel %vm4008_vm4, %v3304_v6, %v1391_v49  ;;  %v931_v49 = vld [vmem:[#allocation2 + $0x48] sm:$0xf]  ;;  %v1363_v63 = vld [vmem:[#allocation2 + $0xc] sm:$0xe] }
  0xed   : > { %v1061_v12 = vrot.slane %v1060_v17, 4  ;;  %v1395_v35 = vsel %vm4008_vm4, %v1393_v20, %v1394_v3  ;;  %v481_v19 = vmul.f32 0.1, %v464_v14  ;;  %v1446_v43 = vunpack.c.l.b16 %v1392_v28  ;;  %v4037_v28 = vld [vmem:[#allocation2 + $0x50] sm:$0x1] }
  0xee   : > { %3258 = vmatmul.msk.bf16.gmra.mxu1 %vm1168_vm12, %v1158_v18  ;;  %v1065_v5 = vrot.slane %v1063_v55, 5  ;;  %v637_v11 = vshrl.u32 %v512_v8, 16  ;;  %v640_v50 = vshll.u32 %v512_v8, 16  ;;  %v1447_v44 = vunpack.c.l.b16 %v1395_v35  ;;  %v3464_v18 = vld [vmem:[#allocation2 + $0x30] sm:$0xff]  ;;  %v1365_v35 = vld [vmem:[#allocation2 + $0x24] sm:$0xe] }
  0xef   : > { %v910_v61 = vld [vmem:[#allocation2 + $0x5c] sm:$0x1]  ;;  %v497_v46 = vmax.f32 %v464_v14, %v481_v19  ;;  %v1092_v60 = vshrl.u32 %v931_v49, 16  ;;  %v1095_v6 = vshll.u32 %v931_v49, 16  ;;  %v1101_v20 = vshll.u32 %v4022_v56, 16 }
  0xf0   : > { %v3997_v7 = vld [vmem:[#allocation2 + $0x40] sm:$0xf]  ;;  %v1066_v16 = vsel %vm3820_vm15, %v1061_v12, %v1065_v5  ;;  %v911_v31 = vsel %vm3776_vm11, 0, %v910_v61  ;;  %v639_v37 = vrot.slane %v637_v11, 7  ;;  %v1462_v17 = vpack.c.b16 %v1447_v44, %v1446_v43  ;;  %v3473_v44 = vld [vmem:[#allocation2 + $0x48] sm:$0xff] }
  0xf1   : > { %v929_v9 = vld [vmem:[#allocation2 + $0x3c] sm:$0xf]  ;;  %v1077_v13 = vshll.u32 %v3997_v7, 16  ;;  %v1081_v62 = vshrl.u32 %v3997_v7, 16  ;;  %v1149_v25 = vunpack.c.l.b16 %v1066_v16  ;;  %912 = vst [vmem:[#allocation2 + $0x5c] sm:$0x1] %v911_v31  ;;  %v513_v55 = vpack.c.bf16 %v497_v46, %v497_v46 }
  0xf2   : > { %v904_v15 = vld [vmem:[#allocation2 + $0x44] sm:$0x1]  ;;  %v1068_v22 = vshrl.u32 %v929_v9, 16  ;;  %v1071_v23 = vshll.u32 %v929_v9, 16  ;;  %v3472_v26 = vld [vmem:[#allocation2 + $0x3c] sm:$0xff]  ;;  %v642_v41 = vor.u32 %v640_v50, %v639_v37  ;;  %v643_v12 = vrot.slane %v639_v37, 4 }
  0xf3   : > { %v905_v24 = vsel %vm3776_vm11, 0, %v904_v15  ;;  %v1160_v33 = vpack.c.b16 %v1149_v25, %v1148_v1  ;;  %v1079_v54 = vrot.slane %v1077_v13, 5  ;;  %v1083_v39 = vrot.slane %v1081_v62, 4 }
  0xf4   : > { %906 = vst [vmem:[#allocation2 + $0x44] sm:$0x1] %v905_v24  ;;  %v1070_v29 = vrot.slane %v1068_v22, 4  ;;  %v1073_v30 = vrot.slane %v1071_v23, 5  ;;  %v734_v4 = vsel %vm3740_vm5, %v642_v41, %v733_v40  ;;  %v645_v2 = vshrl.u32 %v513_v55, 16 }
  0xf5   : > { %3260 = vmatmul.msk.bf16.gmra.mxu2 %vm1168_vm12, %v1160_v33  ;;  %735 = vst [vmem:[#allocation2 + $0x60] sm:$0xf] %v734_v4  ;;  %v1084_v52 = vor.u32 %v1083_v39, %v1079_v54  ;;  %v648_v3 = vshll.u32 %v513_v55, 16  ;;  %v1105_v1 = vshrl.u32 %v4022_v56, 16  ;;  %v3305_v15 = vrot.slane %v1363_v63, 9  ;;  %v3465_v63 = vld [vmem:[#allocation2 + $0x3c] sm:$0xff] }
  0xf6   : > { %v1074_v58 = vor.u32 %v1073_v30, %v1070_v29  ;;  %v647_v14 = vrot.slane %v645_v2, 7  ;;  %v1398_v16 = vrot.slane %v3790_v48, 5  ;;  %v1401_v22 = vrot.slane %v3828_v42, 5  ;;  %v737_v23 = vld [vmem:[#allocation2 + $0x68] sm:$0x1] }
  0xf7   : > { %3356 = vmatmul.msk.bf16.gmra.mxu0 %vm1168_vm12, %v3472_v26  ;;  %v1085_v9 = vrot.slane %v1084_v52, 4  ;;  %v1094_v26 = vrot.slane %v1092_v60, 4  ;;  %v1097_v29 = vrot.slane %v1095_v6, 5  ;;  %v1103_v30 = vrot.slane %v1101_v20, 5  ;;  %v933_v4 = vld [vmem:[#allocation2 + $0x54] sm:$0xf] }
  0xf8   : > { %v1075_v38 = vrot.slane %v1074_v58, 4  ;;  %v650_v24 = vor.u32 %v648_v3, %v647_v14  ;;  %v652_v25 = vrot.slane %v647_v14, 4  ;;  %v1107_v33 = vrot.slane %v1105_v1, 4  ;;  %v4060_v20 = vld [vmem:[#allocation2 + $0x58] sm:$0xf] }
  0xf9   : > { %v1400_v40 = vrot.slane %v1398_v16, 4  ;;  %v1399_v58 = vsel %vm4008_vm4, %v3305_v15, %v1398_v16  ;;  %v3307_v19 = vrot.slane %v1365_v35, 9  ;;  %v1412_v41 = vrot.slane %v3886_v10, 5  ;;  %v1364_v14 = vld [vmem:[#allocation2 + $0x18] sm:$0xe] }
  0xfa   : > { %v1080_v8 = vsel %vm3820_vm15, %v1075_v38, %v1079_v54  ;;  %v651_v48 = vsel %vm3759_vm10, %v643_v12, %v650_v24  ;;  %v738_v42 = vsel %vm3754_vm9, %v652_v25, %v737_v23  ;;  %v1111_v54 = vshll.u32 %v4037_v28, 16  ;;  %v2136_v25 = vld [vmem:[%s4768_s4 + $0x8] sm:$0xc]  ;;  %v4085_v35 = vld [vmem:[#allocation2 + $0x5c] sm:$0x1] }
  0xfb   : > { %v4024_v57 = vld [vmem:[#allocation2 + $0x44] sm:$0x1]  ;;  %3300 = vmatmul.msk.bf16.gmra.mxu3 %vm1168_vm12, %v3464_v18  ;;  %v1150_v50 = vunpack.c.l.b16 %v1080_v8  ;;  %736 = vst.msk [vmem:[#allocation2 + $0x64] sm:$0xf] %vm678_vm3, %v651_v48  ;;  %v1402_v39 = vsel %vm4008_vm4, %v1400_v40, %v1401_v22  ;;  %v1415_v43 = vrot.slane %v3924_v21, 5  ;;  %v1098_v46 = vor.u32 %v1097_v29, %v1094_v26 }
  0xfc   : > { %v1087_v5 = vshll.u32 %v4024_v57, 16  ;;  %v882_v11 = vld [vmem:[#allocation2 + $0x60] sm:$0x1]  ;;  %739 = vst [vmem:[#allocation2 + $0x68] sm:$0x1] %v738_v42  ;;  %v1108_v49 = vor.u32 %v1107_v33, %v1103_v30  ;;  %v1413_v18 = vsel %vm4008_vm4, %v3307_v19, %v1412_v41  ;;  %v1414_v38 = vrot.slane %v1412_v41, 4 }
  0xfd   : > { %v883_v31 = vsel %vm3754_vm9, 0, %v882_v11  ;;  %v1448_v52 = vunpack.c.l.b16 %v1399_v58  ;;  %v1449_v55 = vunpack.c.l.b16 %v1402_v39  ;;  %v1113_v60 = vrot.slane %v1111_v54, 5  ;;  %v1715_v11 = vld [vmem:[#allocation2 + $0xc] sm:$0xf]  ;;  %v4080_v29 = vld [vmem:[#allocation2 + $0x10] sm:$0xf] }
  0xfe   : > { %3312 = vmatmul.msk.bf16.vlgmr.msra.gmra.mxu1 %vm1168_vm12, %v1462_v17  ;;  %v1089_v13 = vrot.slane %v1087_v5, 5  ;;  %884 = vst [vmem:[#allocation2 + $0x60] sm:$0x1] %v883_v31  ;;  %v1405_v17 = vrot.slane %v3868_v51, 5  ;;  %v1116_v10 = vshrl.u32 %v933_v4, 16  ;;  %v1119_v5 = vshll.u32 %v933_v4, 16 }
  0xff   : > { %v1416_v21 = vsel %vm4008_vm4, %v1414_v38, %v1415_v43  ;;  %v1099_v2 = vrot.slane %v1098_v46, 4  ;;  %v1109_v3 = vrot.slane %v1108_v49, 4  ;;  %v1452_v12 = vunpack.c.l.b16 %v1413_v18  ;;  %v2623_v33 = vld [vmem:[%s4768_s4 + $0xc] sm:$0xc]  ;;  %v1366_v38 = vld [vmem:[#allocation2 + $0x30] sm:$0xe] }
 0x100   : > { %v1090_v62 = vsel %vm3820_vm15, %v1085_v9, %v1089_v13  ;;  %v1453_v6 = vunpack.c.l.b16 %v1416_v21  ;;  %v1463_v1 = vpack.c.b16 %v1449_v55, %v1448_v52  ;;  %v1408_v9 = vrot.slane %v3878_v0, 5  ;;  %v3474_v52 = vld [vmem:[#allocation2 + $0x54] sm:$0xff] }
 0x101   : > { %v1151_v61 = vunpack.c.l.b16 %v1090_v62  ;;  %v1407_v15 = vrot.slane %v1405_v17, 4  ;;  %v1118_v16 = vrot.slane %v1116_v10, 4  ;;  %v1121_v22 = vrot.slane %v1119_v5, 5  ;;  %v4100_v21 = vld [vmem:[#allocation2 + $0x14] sm:$0x1] }
 0x102   : > { %v4064_v13 = vpack.c.b16 %v1453_v6, %v1452_v12  ;;  %v1104_v23 = vsel %vm3820_vm15, %v1099_v2, %v1103_v30  ;;  %v1114_v62 = vsel %vm3820_vm15, %v1109_v3, %v1113_v60  ;;  %v1125_v0 = vshll.u32 %v4060_v20, 16  ;;  %v2832_v12 = vld [vmem:[%s4768_s4 + $0x10] sm:$0x3] }
 0x103   : > { %v1161_v37 = vpack.c.b16 %v1151_v61, %v1150_v50  ;;  %v913_v8 = vld [vmem:[#allocation2 + $0x68] sm:$0x1]  ;;  %v1129_v24 = vshrl.u32 %v4060_v20, 16  ;;  %v2162_v26 = vunpack.c.l.b16 %v2136_v25  ;;  %v3306_v50 = vrot.slane %v1364_v14, 9 }
 0x104   : > { %v914_v51 = vsel %vm3776_vm11, 0, %v913_v8  ;;  %v1409_v61 = vsel %vm4008_vm4, %v1407_v15, %v1408_v9  ;;  %v1152_v30 = vunpack.c.l.b16 %v1104_v23  ;;  %v1153_v31 = vunpack.c.l.b16 %v1114_v62  ;;  %v2408_v62 = vld [vmem:[#allocation2 + $0x1c] sm:$0xf] }
 0x105   : > { %3261 = vmatmul.msk.bf16.gmra.mxu2 %vm1168_vm12, %v1161_v37  ;;  %915 = vst [vmem:[#allocation2 + $0x68] sm:$0x1] %v914_v51  ;;  %v1122_v48 = vor.u32 %v1121_v22, %v1118_v16  ;;  %v2163_v42 = vpack.c.b16 %v2162_v26, %v2162_v26  ;;  %v4087_v37 = vrot.slane %v1125_v0, 5  ;;  %v1131_v40 = vrot.slane %v1129_v24, 4  ;;  %v3466_v16 = vld [vmem:[#allocation2 + $0x48] sm:$0xff]  ;;  %v774_v26 = vpop.f32.mrf.mxu1 }
 0x106   : > { %v2649_v58 = vunpack.c.l.b16 %v2623_v33  ;;  %v1740_v54 = vshrl.u32 %v1715_v11, 16  ;;  %v1743_v19 = vshll.u32 %v1715_v11, 16  ;;  %v1749_v41 = vshll.u32 %v4080_v29, 16  ;;  %v2407_v11 = vld [vmem:[#allocation2 + $0x18] sm:$0xf] }
 0x107   : > { %3357 = vmatmul.msk.bf16.gmra.mxu0 %vm1168_vm12, %v3473_v44  ;;  %v2164_v39 = vrot.slane %v2163_v42, 2  ;;  %v1753_v43 = vshrl.u32 %v4080_v29, 16  ;;  %v1162_v46 = vpack.c.b16 %v1153_v31, %v1152_v30  ;;  %v1406_v49 = vsel %vm4008_vm4, %v3306_v50, %v1405_v17 }
 0x108   : > { %v2650_v44 = vpack.c.b16 %v2649_v58, %v2649_v58  ;;  %v1135_v4 = vshll.u32 %v4085_v35, 16  ;;  %v1451_v55 = vunpack.c.l.b16 %v1409_v61  ;;  %v1123_v60 = vrot.slane %v1122_v48, 4 }
 0x109   : > { %v2190_v18 = vsel %vm1193_vm2, %v2164_v39, 0  ;;  %v1132_v10 = vor.u32 %v1131_v40, %v4087_v37  ;;  %v1742_v17 = vrot.slane %v1740_v54, 4  ;;  %v4103_v2 = vrot.slane %v1749_v41, 5 }
 0x10a   : > { %2199 = vmatpush.bf16.msra.mxu3 %v2190_v18  ;;  %v2651_v5 = vrot.slane %v2650_v44, 2  ;;  %v1755_v3 = vrot.slane %v1753_v43, 4  ;;  %v3308_v8 = vrot.slane %v1366_v38, 9  ;;  %v1419_v9 = vrot.slane %v3951_v45, 5  ;;  %v2409_v38 = vld [vmem:[#allocation2 + $0x20] sm:$0x1] }
 0x10b   : > { %3301 = vmatmul.msk.bf16.gmra.mxu3 %vm1168_vm12, %v3465_v63  ;;  %v1745_v63 = vrot.slane %v1743_v19, 5  ;;  %v1450_v51 = vunpack.c.l.b16 %v1406_v49  ;;  %v1137_v14 = vrot.slane %v1135_v4, 5  ;;  %v1422_v15 = vrot.slane %v3986_v47, 5  ;;  %v3567_v47 = vld [vmem:[%s4767_s3] ss:$0 sm:$0xff] }
 0x10c   : > { %v2677_v6 = vsel %vm1193_vm2, %v2651_v5, 0  ;;  %v1133_v22 = vrot.slane %v1132_v10, 4  ;;  %v1759_v23 = vshll.u32 %v4100_v21, 16  ;;  %v1420_v0 = vsel %vm4008_vm4, %v3308_v8, %v1419_v9  ;;  %v2274_v19 = vld [vmem:[%s4768_s4 + $0xc] sm:$0x3] }
 0x10d   : > { %2686 = vmatpush.bf16.msra.mxu0 %v2677_v6  ;;  %v1421_v24 = vrot.slane %v1419_v9, 4  ;;  %v1464_v25 = vpack.c.b16 %v1451_v55, %v1450_v51  ;;  %v1128_v45 = vsel %vm3820_vm15, %v1123_v60, %v4087_v37  ;;  %v775_v50 = vadd.f32 %v3567_v47, %v774_v26  ;;  %v776_v6 = vpop.f32.mrf.mxu1 }
 0x10e   : > { %3313 = vmatmul.msk.bf16.gmra.mxu1 %vm1168_vm12, %v1463_v1  ;;  %v2882_v1 = vsel %vm1193_vm2, %v2832_v12, 0  ;;  %v1746_v61 = vor.u32 %v1745_v63, %v1742_v17  ;;  %v1756_v30 = vor.u32 %v1755_v3, %v4103_v2  ;;  %v2441_v48 = vshll.u32 %v2408_v62, 16 }
 0x10f   : > { %2891 = vmatpush.bf16.msra.mxu2 %v2882_v1  ;;  %v1423_v31 = vsel %vm4008_vm4, %v1421_v24, %v1422_v15  ;;  %v2445_v42 = vshrl.u32 %v2408_v62, 16  ;;  %v1454_v33 = vunpack.c.l.b16 %v1420_v0  ;;  %v1138_v40 = vsel %vm3820_vm15, %v1133_v22, %v1137_v14  ;;  %v3475_v1 = vld [vmem:[#allocation2 + $0x60] sm:$0xff]  ;;  %v1718_v24 = vld [vmem:[#allocation2 + $0x18] sm:$0xf] }
 0x110   : > { %v1455_v37 = vunpack.c.l.b16 %v1423_v31  ;;  %v781_v58 = vmul.f32 0.1, %v775_v50  ;;  %v1761_v54 = vrot.slane %v1759_v23, 5  ;;  %v2432_v39 = vshrl.u32 %v2407_v11, 16 }
 0x111   : > { %v825_v41 = vstv %s792_s10  ;;  %v2435_v43 = vshll.u32 %v2407_v11, 16  ;;  %v1154_v49 = vunpack.c.l.b16 %v1128_v45  ;;  %v1747_v18 = vrot.slane %v1746_v61, 4 }
 0x112   : > { %v4133_v44 = vpack.c.b16 %v1455_v37, %v1454_v33  ;;  %v785_v4 = vmax.f32 %v775_v50, %v781_v58  ;;  %v1757_v55 = vrot.slane %v1756_v30, 4  ;;  %v4136_v60 = vrot.slane %v2441_v48, 5  ;;  %v851_v50 = vld [vmem:[#allocation2 + $0x6c] sm:$0xf] }
 0x113   : > { %v2447_v10 = vrot.slane %v2445_v42, 4  ;;  %v2434_v63 = vrot.slane %v2432_v39, 4  ;;  %v2437_v3 = vrot.slane %v2435_v43, 5  ;;  %v2451_v12 = vshll.u32 %v2409_v38, 16  ;;  %v3467_v42 = vld [vmem:[#allocation2 + $0x54] sm:$0xff] }
 0x114   : > { %v826_v5 = vmul.f32 %v825_v41, %v785_v4  ;;  %v1762_v17 = vsel %vm3820_vm15, %v1757_v55, %v1761_v54  ;;  %v777_v9 = vadd.f32 %v3567_v47, %v776_v6  ;;  %v1752_v14 = vsel %vm3820_vm15, %v1747_v18, %v4103_v2  ;;  %v2410_v4 = vld [vmem:[#allocation2 + $0x24] sm:$0xf] }
 0x115   : > { %3262 = vmatmul.msk.bf16.gmra.mxu2 %vm1168_vm12, %v1162_v46  ;;  %v2340_v46 = vsel %vm1193_vm2, %v2274_v19, 0  ;;  %v2448_v15 = vor.u32 %v2447_v10, %v4136_v60  ;;  %v4144_v62 = vunpack.c.l.b16 %v1762_v17  ;;  %v2453_v45 = vrot.slane %v2451_v12, 5 }
 0x116   : > { %2349 = vmatpush.bf16.msrb.mxu1 %v2340_v46  ;;  %v828_v8 = vpack.c.bf16 %v826_v5, %v826_v5  ;;  %v782_v0 = vmul.f32 0.1, %v777_v9  ;;  %v2082_v26 = vrot.slane %v4080_v29, 5  ;;  %v4149_v47 = vunpack.c.l.b16 %v1752_v14  ;;  %v4154_v29 = vld [vmem:[#allocation2 + $0x1c] sm:$0xf] }
 0x117   : > { %3358 = vmatmul.msk.bf16.gmra.mxu0 %vm1168_vm12, %v3474_v52  ;;  %v1155_v52 = vunpack.c.l.b16 %v1138_v40  ;;  %v2449_v61 = vrot.slane %v2448_v15, 4  ;;  %v1764_v31 = vshrl.u32 %v1718_v24, 16  ;;  %v1767_v48 = vshll.u32 %v1718_v24, 16  ;;  %v4178_v14 = vld [vmem:[#allocation2 + $0x20] sm:$0x1] }
 0x118   : > { %v831_v22 = vshrl.u32 %v828_v8, 16  ;;  %v834_v23 = vshll.u32 %v828_v8, 16  ;;  %v786_v2 = vmax.f32 %v777_v9, %v782_v0  ;;  %v1948_v37 = vpack.c.b16 %v4144_v62, %v4149_v47 }
 0x119   : > { %v1163_v51 = vpack.c.b16 %v1155_v52, %v1154_v49  ;;  %v2085_v40 = vrot.slane %v4100_v21, 5  ;;  %v2454_v39 = vsel %vm3820_vm15, %v2449_v61, %v2453_v45  ;;  %v2084_v43 = vrot.slane %v2082_v26, 4  ;;  %v1367_v21 = vld [vmem:[#allocation2 + $0x3c] sm:$0xe] }
 0x11a   : > { %v833_v11 = vrot.slane %v831_v22, 7  ;;  %v827_v58 = vmul.f32 %v825_v41, %v786_v2  ;;  %v1426_v41 = vrot.slane %v3997_v7, 5  ;;  %v1429_v18 = vrot.slane %v4024_v57, 5 }
 0x11b   : > { %3302 = vmatmul.msk.bf16.gmra.mxu3 %vm1168_vm12, %v3466_v16  ;;  %v2048_v16 = vld [vmem:[#allocation2 + $0xc] sm:$0xe]  ;;  %v1766_v38 = vrot.slane %v1764_v31, 4  ;;  %v1769_v52 = vrot.slane %v1767_v48, 5  ;;  %v1773_v55 = vshll.u32 %v4154_v29, 16  ;;  %v3309_v10 = vrot.slane %v1367_v21, 9 }
 0x11c   : > { %v3368_v30 = vrot.slane %v2048_v16, 9  ;;  %v836_v33 = vor.u32 %v834_v23, %v833_v11  ;;  %v829_v49 = vpack.c.bf16 %v827_v58, %v827_v58  ;;  %v1777_v36 = vshrl.u32 %v4154_v29, 16  ;;  %v2412_v48 = vld [vmem:[#allocation2 + $0x2c] sm:$0x1] }
 0x11d   : > { %v2625_v57 = vunpack.c.l.b16 %v2454_v39  ;;  %v2456_v12 = vshrl.u32 %v2410_v4, 16  ;;  %v1427_v6 = vsel %vm4008_vm4, %v3309_v10, %v1426_v41  ;;  %v2459_v9 = vshll.u32 %v2410_v4, 16 }
 0x11e   : > { %3314 = vmatmul.msk.bf16.gmra.mxu1 %vm1168_vm12, %v1464_v25  ;;  %v2438_v25 = vor.u32 %v2437_v3, %v2434_v63  ;;  %v4160_v19 = vsel %vm4008_vm4, %v3368_v30, %v2082_v26  ;;  %v852_v46 = vsel %vm3740_vm5, %v836_v33, %v851_v50  ;;  %v839_v5 = vshrl.u32 %v829_v49, 16  ;;  %v2411_v63 = vld [vmem:[#allocation2 + $0x28] sm:$0xf] }
 0x11f   : > { %853 = vst [vmem:[#allocation2 + $0x6c] sm:$0xf] %v852_v46  ;;  %v842_v17 = vshll.u32 %v829_v49, 16  ;;  %v1428_v3 = vrot.slane %v1426_v41, 4  ;;  %v2465_v15 = vshll.u32 %v2411_v63, 16  ;;  %v2469_v16 = vshrl.u32 %v2411_v63, 16 }
 0x120   : > { %v2439_v54 = vrot.slane %v2438_v25, 4  ;;  %v841_v8 = vrot.slane %v839_v5, 7  ;;  %v1456_v22 = vunpack.c.l.b16 %v1427_v6  ;;  %v1775_v24 = vrot.slane %v1773_v55, 5  ;;  %v1721_v46 = vld [vmem:[#allocation2 + $0x24] sm:$0xf] }
 0x121   : > { %v1779_v25 = vrot.slane %v1777_v36, 4  ;;  %v2086_v26 = vsel %vm4008_vm4, %v2084_v43, %v2085_v40  ;;  %v1783_v31 = vshll.u32 %v4178_v14, 16  ;;  %v2461_v40 = vrot.slane %v2459_v9, 5  ;;  %v2413_v63 = vld [vmem:[#allocation2 + $0x30] sm:$0xf] }
 0x122   : > { %v2444_v7 = vsel %vm3820_vm15, %v2439_v54, %v4136_v60  ;;  %v844_v0 = vor.u32 %v842_v17, %v841_v8  ;;  %v846_v60 = vrot.slane %v841_v8, 4  ;;  %v2467_v58 = vrot.slane %v2465_v15, 5 }
 0x123   : > { %v2624_v45 = vunpack.c.l.b16 %v2444_v7  ;;  %v2471_v54 = vrot.slane %v2469_v16, 4  ;;  %v2138_v43 = vunpack.c.l.b16 %v2086_v26  ;;  %v1780_v59 = vor.u32 %v1779_v25, %v1775_v24  ;;  %v4217_v16 = vld [vmem:[#allocation2 + $0x2c] sm:$0x1] }
 0x124   : > { %v2475_v4 = vshll.u32 %v2412_v48, 16  ;;  %v2137_v53 = vunpack.c.l.b16 %v4160_v19  ;;  %v1785_v21 = vrot.slane %v1783_v31, 5  ;;  %v1791_v55 = vshll.u32 %v1721_v46, 16 }
 0x125   : > { %3263 = vmatmul.msk.bf16.gmra.mxu2 %vm1168_vm12, %v1163_v51  ;;  %v855_v51 = vld [vmem:[#allocation2 + $0x74] sm:$0x1]  ;;  %v2640_v39 = vpack.c.b16 %v2625_v57, %v2624_v45  ;;  %v1781_v5 = vrot.slane %v1780_v59, 4  ;;  %v2089_v19 = vrot.slane %v4154_v29, 5  ;;  %v2049_v57 = vld [vmem:[#allocation2 + $0x18] sm:$0xe] }
 0x126   : > { %v885_v50 = vld [vmem:[#allocation2 + $0x6c] sm:$0x1]  ;;  %v856_v30 = vsel %vm3754_vm9, %v846_v60, %v855_v51  ;;  %v2153_v10 = vpack.c.b16 %v2138_v43, %v2137_v53  ;;  %v2477_v47 = vrot.slane %v2475_v4, 5  ;;  %v1793_v6 = vrot.slane %v1791_v55, 5 }
 0x127   : > { %3359 = vmatmul.msk.bf16.gmra.mxu0 %vm1168_vm12, %v3475_v1  ;;  %v837_v1 = vrot.slane %v833_v11, 4  ;;  %v1770_v11 = vor.u32 %v1769_v52, %v1766_v38  ;;  %v886_v33 = vsel %vm3754_vm9, 0, %v885_v50  ;;  %857 = vst [vmem:[#allocation2 + $0x74] sm:$0x1] %v856_v30  ;;  %v4198_v38 = vld [vmem:[#allocation2 + $0x28] sm:$0xf] }
 0x128   : > { %887 = vst [vmem:[#allocation2 + $0x6c] sm:$0x1] %v886_v33  ;;  %v1788_v52 = vshrl.u32 %v1721_v46, 16  ;;  %v1797_v17 = vshll.u32 %v4198_v38, 16  ;;  %v1801_v36 = vshrl.u32 %v4198_v38, 16  ;;  %v2092_v9 = vrot.slane %v4178_v14, 5 }
 0x129   : > { %v845_v61 = vsel %vm3759_vm10, %v837_v1, %v844_v0  ;;  %v1771_v49 = vrot.slane %v1770_v11, 4  ;;  %v3369_v11 = vrot.slane %v2049_v57, 9  ;;  %v1368_v57 = vld [vmem:[#allocation2 + $0x48] sm:$0xe]  ;;  %vm3064_vm2 = vcmask 60416  }
 0x12a   : > { %854 = vst.msk [vmem:[#allocation2 + $0x70] sm:$0xf] %vm678_vm3, %v845_v61  ;;  %v1799_v60 = vrot.slane %v1797_v17, 5  ;;  %v1807_v61 = vshll.u32 %v4217_v16, 16 }
 0x12b   : > { %3303 = vmatmul.msk.bf16.gmra.mxu3 %vm1168_vm12, %v3467_v42  ;;  %v2458_v42 = vrot.slane %v2456_v12, 4  ;;  %v1776_v62 = vsel %vm3820_vm15, %v1771_v49, %v1775_v24  ;;  %v1790_v12 = vrot.slane %v1788_v52, 4  ;;  %v1803_v24 = vrot.slane %v1801_v36, 4 }
 0x12c   : > { %v1934_v8 = vunpack.c.l.b16 %v1776_v62  ;;  %v2090_v33 = vsel %vm4008_vm4, %v3369_v11, %v2089_v19  ;;  %v1809_v49 = vrot.slane %v1807_v61, 5 }
 0x12d   : > { %v2462_v41 = vor.u32 %v2461_v40, %v2458_v42  ;;  %v1794_v25 = vor.u32 %v1793_v6, %v1790_v12  ;;  %v1804_v40 = vor.u32 %v1803_v24, %v1799_v60  ;;  %v2139_v53 = vunpack.c.l.b16 %v2090_v33 }
 0x12e   : > { %3315 = vmatmul.msk.bf16.gmra.mxu1 %vm1168_vm12, %v4064_v13  ;;  %v1430_v13 = vsel %vm4008_vm4, %v1428_v3, %v1429_v18  ;;  %v2472_v18 = vor.u32 %v2471_v54, %v2467_v58  ;;  %v916_v1 = vld [vmem:[#allocation2 + $0x74] sm:$0x1]  ;;  %v1433_v12 = vrot.slane %v4022_v56, 5 }
 0x12f   : > { %v1457_v23 = vunpack.c.l.b16 %v1430_v13  ;;  %v2463_v3 = vrot.slane %v2462_v41, 4  ;;  %v4211_v13 = vld [vmem:[#allocation2 + $0x34] sm:$0xf]  ;;  %v917_v51 = vsel %vm3776_vm11, 0, %v916_v1  ;;  %v1805_v52 = vrot.slane %v1804_v40, 4 }
 0x130   : > { %v2473_v7 = vrot.slane %v2472_v18, 4  ;;  %918 = vst [vmem:[#allocation2 + $0x74] sm:$0x1] %v917_v51  ;;  %v2489_v45 = vshll.u32 %v4211_v13, 16  ;;  %v2493_v34 = vshrl.u32 %v4211_v13, 16 }
 0x131   : > { %v4182_v2 = vpack.c.b16 %v1457_v23, %v1456_v22  ;;  %v2480_v22 = vshrl.u32 %v2413_v63, 16  ;;  %v2483_v23 = vshll.u32 %v2413_v63, 16  ;;  %v2468_v14 = vsel %vm3820_vm15, %v2463_v3, %v2467_v58  ;;  %v4228_v58 = vld [vmem:[#allocation2 + $0x38] sm:$0x1]  ;;  %v1724_v18 = vld [vmem:[#allocation2 + $0x30] sm:$0xf] }
 0x132   : > { %v2478_v15 = vsel %vm3820_vm15, %v2473_v7, %v2477_v47  ;;  %v2626_v42 = vunpack.c.l.b16 %v2468_v14  ;;  %v2491_v43 = vrot.slane %v2489_v45, 5  ;;  %v2495_v59 = vrot.slane %v2493_v34, 4  ;;  %v4238_v3 = vld [vmem:[#allocation2 + $0x34] sm:$0xf]  ;;  %v4245_v51 = vld [vmem:[#allocation2 + $0x40] sm:$0xf] }
 0x133   : > { %v2627_v26 = vunpack.c.l.b16 %v2478_v15  ;;  %v2482_v30 = vrot.slane %v2480_v22, 4  ;;  %v2485_v31 = vrot.slane %v2483_v23, 5  ;;  %v2499_v41 = vshll.u32 %v4228_v58, 16 }
 0x134   : > { %v1810_v62 = vsel %vm3820_vm15, %v1805_v52, %v1809_v49  ;;  %v2096_v47 = vrot.slane %v4198_v38, 5  ;;  %v2050_v38 = vld [vmem:[#allocation2 + $0x24] sm:$0xe]  ;;  %v1821_v23 = vshll.u32 %v4238_v3, 16  ;;  %v1825_v24 = vshrl.u32 %v4238_v3, 16 }
 0x135   : > { %3360 = vmatmul.msk.bf16.vlgmr.msrb.gmra.mxu2 %vm1168_vm12, %v1948_v37  ;;  %v1786_v37 = vsel %vm3820_vm15, %v1781_v5, %v1785_v21  ;;  %v2641_v46 = vpack.c.b16 %v2627_v26, %v2626_v42  ;;  %v2486_v21 = vor.u32 %v2485_v31, %v2482_v30  ;;  %v2496_v5 = vor.u32 %v2495_v59, %v2491_v43  ;;  %v4260_v31 = vld [vmem:[#allocation2 + $0x38] sm:$0x1] }
 0x136   : > { %v1935_v0 = vunpack.c.l.b16 %v1786_v37  ;;  %v1812_v37 = vshrl.u32 %v1724_v18, 16  ;;  %v2501_v63 = vrot.slane %v2499_v41, 5  ;;  %v1937_v1 = vunpack.c.l.b16 %v1810_v62 }
 0x137   : > { %3424 = vmatmul.msk.bf16.vlgmr.msra.gmra.mxu0 %vm1168_vm12, %v2640_v39  ;;  %v1795_v39 = vrot.slane %v1794_v25, 4  ;;  %v2487_v36 = vrot.slane %v2486_v21, 4  ;;  %v2098_v15 = vrot.slane %v2096_v47, 4  ;;  %v1435_v14 = vrot.slane %v1433_v12, 4 }
 0x138   : > { %v1949_v48 = vpack.c.b16 %v1935_v0, %v1934_v8  ;;  %v2099_v8 = vrot.slane %v4217_v16, 5  ;;  %v1814_v22 = vrot.slane %v1812_v37, 4  ;;  %v2416_v0 = vld [vmem:[#allocation2 + $0x3c] sm:$0xf]  ;;  %v1436_v25 = vrot.slane %v4037_v28, 5 }
 0x139   : > { %v2492_v56 = vsel %vm3820_vm15, %v2487_v36, %v2491_v43  ;;  %v2517_v45 = vshrl.u32 %v4245_v51, 16  ;;  %v3370_v34 = vrot.slane %v2050_v38, 9  ;;  %v2504_v26 = vshrl.u32 %v2416_v0, 16  ;;  %v4284_v38 = vld [vmem:[#allocation2 + $0x40] sm:$0xf] }
 0x13a   : > { %v2507_v11 = vshll.u32 %v2416_v0, 16  ;;  %v2100_v30 = vsel %vm4008_vm4, %v2098_v15, %v2099_v8  ;;  %v2628_v33 = vunpack.c.l.b16 %v2492_v56  ;;  %v1823_v40 = vrot.slane %v1821_v23, 5  ;;  %v2419_v56 = vld [vmem:[#allocation2 + $0x48] sm:$0xf] }
 0x13b   : > { %3376 = vmatmul.msk.bf16.vlgmr.msra.gmra.mxu3 %vm1168_vm12, %v2153_v10  ;;  %v1800_v10 = vsel %vm3820_vm15, %v1795_v39, %v1799_v60  ;;  %v3310_v60 = vrot.slane %v1368_v57, 9  ;;  %v4264_v39 = vld [vmem:[#allocation2 + $0x44] sm:$0x1]  ;;  %v1437_v59 = vsel %vm4008_vm4, %v1435_v14, %v1436_v25  ;;  %v2519_v49 = vrot.slane %v2517_v45, 4  ;;  %v1727_v57 = vld [vmem:[#allocation2 + $0x3c] sm:$0xf] }
 0x13c   : > { %v1936_v6 = vunpack.c.l.b16 %v1800_v10  ;;  %v1831_v21 = vshll.u32 %v4260_v31, 16  ;;  %v2506_v41 = vrot.slane %v2504_v26, 4  ;;  %v1459_v37 = vunpack.c.l.b16 %v1437_v59  ;;  %v4291_v14 = vld [vmem:[#allocation2 + $0x4c] sm:$0xf] }
 0x13d   : > { %v1434_v28 = vsel %vm4008_vm4, %v3310_v60, %v1433_v12  ;;  %v1443_v12 = vrot.slane %v4085_v35, 5  ;;  %v2106_v23 = vrot.slane %v4260_v31, 5  ;;  %v2103_v0 = vrot.slane %v4238_v3, 5 }
 0x13e   : > { %3316 = vmatmul.msk.bf16.gmra.mxu1 %vm1168_vm12, %v4133_v44  ;;  %v1322_v29 = vpop.f32.mrf.mxu3  ;;  %v2091_v44 = vrot.slane %v2089_v19, 4  ;;  %v1815_v19 = vshll.u32 %v1724_v18, 16  ;;  %v2509_v18 = vrot.slane %v2507_v11, 5  ;;  %v1458_v62 = vunpack.c.l.b16 %v1434_v28 }
 0x13f   : > { %v1833_v36 = vrot.slane %v1831_v21, 5  ;;  %v1836_v60 = vshrl.u32 %v1727_v57, 16  ;;  %v1845_v11 = vshll.u32 %v4284_v38, 16  ;;  %v2531_v31 = vshll.u32 %v2419_v56, 16  ;;  %v4310_v21 = vld [vmem:[#allocation2 + $0x44] sm:$0x1] }
 0x140   : > { %v2093_v50 = vsel %vm4008_vm4, %v2091_v44, %v2092_v9  ;;  %v2497_v9 = vrot.slane %v2496_v5, 4  ;;  %v2523_v5 = vshll.u32 %v4264_v39, 16 }
 0x141   : > { %v2140_v54 = vunpack.c.l.b16 %v2093_v50  ;;  %v1950_v50 = vpack.c.b16 %v1937_v1, %v1936_v6  ;;  %v1838_v28 = vrot.slane %v1836_v60, 4 }
 0x142   : > { %v2502_v16 = vsel %vm3820_vm15, %v2497_v9, %v2501_v63  ;;  %v2510_v63 = vor.u32 %v2509_v18, %v2506_v41  ;;  %v2525_v8 = vrot.slane %v2523_v5, 5  ;;  %v2051_v9 = vld [vmem:[#allocation2 + $0x30] sm:$0xe]  ;;  %v4312_v41 = vpop.f32.mrf.mxu0 }
 0x143   : > { %v2154_v55 = vpack.c.b16 %v2140_v54, %v2139_v53  ;;  %v2629_v61 = vunpack.c.l.b16 %v2502_v16  ;;  %v1827_v54 = vrot.slane %v1825_v24, 4  ;;  %v2097_v53 = vsel %vm4008_vm4, %v3370_v34, %v2096_v47 }
 0x144   : > { %v1839_v24 = vshll.u32 %v1727_v57, 16  ;;  %v2511_v45 = vrot.slane %v2510_v63, 4  ;;  %v1440_v34 = vrot.slane %v4060_v20, 5  ;;  %v3371_v26 = vrot.slane %v2051_v9, 9  ;;  %v4324_v57 = vld [vmem:[#allocation2 + $0x50] sm:$0x1] }
 0x145   : > { %3361 = vmatmul.msk.bf16.gmra.mxu2 %vm1168_vm12, %v1949_v48  ;;  %v2642_v52 = vpack.c.b16 %v2629_v61, %v2628_v33  ;;  %v2105_v33 = vrot.slane %v2103_v0, 4  ;;  %v1855_v63 = vshll.u32 %v4310_v21, 16  ;;  %v2547_v60 = vshll.u32 %v4324_v57, 16 }
 0x146   : > { %v1324_v4 = vpop.f32.mrf.mxu3 }
 0x147   : > { %3425 = vmatmul.msk.bf16.gmra.mxu0 %vm1168_vm12, %v2641_v46 }
 0x14b   : > { %v1206_v17 = vpop.f32.mrf.mxu1  ;;  %3377 = vmatmul.msk.bf16.gmra.mxu3 %vm1168_vm12, %v2154_v55  ;;  %v2142_v55 = vunpack.c.l.b16 %v2100_v30  ;;  %v2528_v30 = vshrl.u32 %v2419_v56, 16 }
 0x14c   : > { %v4240_v7 = vadd.f32 %v1322_v29, %v1206_v17  ;;  %v1817_v29 = vrot.slane %v1815_v19, 5  ;;  %v1828_v19 = vor.u32 %v1827_v54, %v1823_v40  ;;  %v2141_v17 = vunpack.c.l.b16 %v2097_v53 }
 0x14d   : > { %v2104_v53 = vsel %vm4008_vm4, %v3371_v26, %v2103_v0 }
 0x14e   : > { %3317 = vmatmul.msk.bf16.gmra.mxu1 %vm1168_vm12, %v4182_v2  ;;  %v1327_v44 = vpop.f32.mrf.mxu3  ;;  %v2513_v2 = vshll.u32 %v4245_v51, 16  ;;  %v1818_v48 = vor.u32 %v1817_v29, %v1814_v22  ;;  %v2155_v6 = vpack.c.b16 %v2142_v55, %v2141_v17  ;;  %v1468_v22 = vpack.c.b16 %v1459_v37, %v1458_v62 }
 0x14f   : > { %v1829_v29 = vrot.slane %v1828_v19, 4  ;;  %v4316_v55 = vrot.slane %v1845_v11, 5  ;;  %v2530_v62 = vrot.slane %v2528_v30, 4  ;;  %v2533_v37 = vrot.slane %v2531_v31, 5 }
 0x150   : > { %v4270_v46 = vrot.slane %v2513_v2, 5  ;;  %v1819_v10 = vrot.slane %v1818_v48, 4  ;;  %v2537_v48 = vshll.u32 %v4291_v14, 16  ;;  %v2143_v0 = vunpack.c.l.b16 %v2104_v53  ;;  %v4354_v53 = vld [vmem:[#allocation2 + $0x58] sm:$0xf] }
 0x151   : > { %v1834_v25 = vsel %vm3820_vm15, %v1829_v29, %v1833_v36  ;;  %v1730_v29 = vld [vmem:[#allocation2 + $0x48] sm:$0xf]  ;;  %v2534_v56 = vor.u32 %v2533_v37, %v2530_v62  ;;  %v2110_v30 = vrot.slane %v4284_v38, 5  ;;  %v4359_v62 = vld [vmem:[#allocation2 + $0x50] sm:$0x1] }
 0x152   : > { %v2520_v47 = vor.u32 %v2519_v49, %v4270_v46  ;;  %v1824_v1 = vsel %vm3820_vm15, %v1819_v10, %v1823_v40  ;;  %v1939_v20 = vunpack.c.l.b16 %v1834_v25  ;;  %v1841_v40 = vrot.slane %v1839_v24, 5 }
 0x153   : > { %v1208_v42 = vpop.f32.mrf.mxu1  ;;  %v1938_v2 = vunpack.c.l.b16 %v1824_v1  ;;  %v2516_v54 = vsel %vm3820_vm15, %v2511_v45, %v4270_v46  ;;  %v1442_v49 = vrot.slane %v1440_v34, 4  ;;  %v4318_v46 = vrot.slane %v2537_v48, 5 }
 0x154   : > { %v4266_v43 = vadd.f32 %v1324_v4, %v1208_v42  ;;  %v2521_v35 = vrot.slane %v2520_v47, 4  ;;  %v2541_v42 = vshrl.u32 %v4291_v14, 16  ;;  %v2630_v47 = vunpack.c.l.b16 %v2516_v54 }
 0x155   : > { %3362 = vmatmul.msk.bf16.gmra.mxu2 %vm1168_vm12, %v1950_v50  ;;  %v1849_v50 = vshrl.u32 %v4284_v38, 16  ;;  %v1842_v36 = vor.u32 %v1841_v40, %v1838_v28  ;;  %v1860_v45 = vshrl.u32 %v1730_v29, 16  ;;  %v2113_v48 = vrot.slane %v4310_v21, 5  ;;  %v2422_v28 = vld [vmem:[#allocation2 + $0x54] sm:$0xf]  ;;  %v4343_v40 = vpop.f32.mrf.mxu0 }
 0x156   : > { %v4276_v4 = vpop.f32.mrf.mxu3  ;;  %v2526_v3 = vsel %vm3820_vm15, %v2521_v35, %v2525_v8  ;;  %v2543_v19 = vrot.slane %v2541_v42, 4  ;;  %v1444_v8 = vsel %vm4008_vm4, %v1442_v49, %v1443_v12  ;;  %v2535_v42 = vrot.slane %v2534_v56, 4  ;;  %v2052_v21 = vld [vmem:[#allocation2 + $0x3c] sm:$0xe] }
 0x157   : > { %3426 = vmatmul.msk.bf16.gmra.mxu0 %vm1168_vm12, %v2642_v52  ;;  %v2631_v18 = vunpack.c.l.b16 %v2526_v3  ;;  %v2107_v52 = vsel %vm4008_vm4, %v2105_v33, %v2106_v23  ;;  %v1851_v10 = vrot.slane %v1849_v50, 4  ;;  %v1461_v24 = vunpack.c.l.b16 %v1444_v8 }
 0x158   : > { %v2544_v35 = vor.u32 %v2543_v19, %v4318_v46  ;;  %v1843_v25 = vrot.slane %v1842_v36, 4  ;;  %v2549_v33 = vrot.slane %v2547_v60, 5  ;;  %v2552_v37 = vshrl.u32 %v2422_v28, 16 }
 0x159   : > { %v2643_v9 = vpack.c.b16 %v2631_v18, %v2630_v47  ;;  %v1862_v18 = vrot.slane %v1860_v45, 4  ;;  %v2555_v19 = vshll.u32 %v2422_v28, 16 }
 0x15a   : > { %v1848_v49 = vsel %vm3820_vm15, %v1843_v25, %v4316_v55 }
 0x15b   : > { %v1211_v15 = vpop.f32.mrf.mxu1  ;;  %3378 = vmatmul.msk.bf16.gmra.mxu3 %vm1168_vm12, %v2155_v6  ;;  %v1951_v6 = vpack.c.b16 %v1939_v20, %v1938_v2  ;;  %v1857_v2 = vrot.slane %v1855_v63, 5  ;;  %v2545_v20 = vrot.slane %v2544_v35, 4  ;;  %v2561_v63 = vshll.u32 %v4354_v53, 16 }
 0x15c   : > { %v4288_v16 = vadd.f32 %v1327_v44, %v1211_v15  ;;  %v1369_v44 = vld [vmem:[#allocation2 + $0x54] sm:$0xe]  ;;  %v2144_v15 = vunpack.c.l.b16 %v2107_v52  ;;  %v1940_v8 = vunpack.c.l.b16 %v1848_v49 }
 0x15d   : > { %v3311_v59 = vrot.slane %v1369_v44, 9  ;;  %v2550_v36 = vsel %vm3820_vm15, %v2545_v20, %v2549_v33  ;;  %v4376_v45 = vrot.slane %v2561_v63, 5 }
 0x15e   : > { %3318 = vmatmul.msk.bf16.gmra.mxu1 %vm1168_vm12, %v1468_v22  ;;  %v4301_v61 = vpop.f32.mrf.mxu3  ;;  %v1852_v22 = vor.u32 %v1851_v10, %v4316_v55  ;;  %v2156_v11 = vpack.c.b16 %v2144_v15, %v2143_v0  ;;  %v2540_v55 = vsel %vm3820_vm15, %v2535_v42, %v4318_v46  ;;  %v3372_v15 = vrot.slane %v2052_v21, 9  ;;  %v4383_v42 = vpop.f32.mrf.mxu0 }
 0x15f   : > { %v1441_v1 = vsel %vm4008_vm4, %v3311_v59, %v1440_v34  ;;  %v1863_v34 = vshll.u32 %v1730_v29, 16  ;;  %v1879_v46 = vshll.u32 %v4359_v62, 16  ;;  %v2632_v35 = vunpack.c.l.b16 %v2540_v55 }
 0x160   : > { %v1460_v12 = vunpack.c.l.b16 %v1441_v1  ;;  %v1853_v50 = vrot.slane %v1852_v22, 4  ;;  %v2633_v60 = vunpack.c.l.b16 %v2550_v36 }
 0x161   : > { %v1865_v52 = vrot.slane %v1863_v34, 5 }
 0x162   : > { %v1469_v59 = vpack.c.b16 %v1461_v24, %v1460_v12  ;;  %v1858_v38 = vsel %vm3820_vm15, %v1853_v50, %v1857_v2  ;;  %v2554_v12 = vrot.slane %v2552_v37, 4  ;;  %v2557_v24 = vrot.slane %v2555_v19, 5  ;;  %v4374_v2 = vld [vmem:[#allocation2 + $0x5c] sm:$0x1] }
 0x163   : > { %v1213_v5 = vpop.f32.mrf.mxu1  ;;  %v1866_v29 = vor.u32 %v1865_v52, %v1862_v18  ;;  %v2644_v20 = vpack.c.b16 %v2633_v60, %v2632_v35  ;;  %v2571_v28 = vshll.u32 %v4374_v2, 16 }
 0x164   : > { %v4321_v17 = vadd.f32 %v4276_v4, %v1213_v5  ;;  %v4331_v4 = vld [vmem:[#allocation2 + $0x4c] sm:$0xf]  ;;  %v2558_v33 = vor.u32 %v2557_v24, %v2554_v12 }
 0x165   : > { %3363 = vmatmul.msk.bf16.gmra.mxu2 %vm1168_vm12, %v1951_v6  ;;  %v1869_v3 = vshll.u32 %v4331_v4, 16  ;;  %v1873_v44 = vshrl.u32 %v4331_v4, 16  ;;  %v2565_v6 = vshrl.u32 %v4354_v53, 16  ;;  %v1867_v50 = vrot.slane %v1866_v29, 4 }
 0x166   : > { %v4333_v23 = vpop.f32.mrf.mxu3  ;;  %v2559_v37 = vrot.slane %v2558_v33, 4  ;;  %v2573_v19 = vrot.slane %v2571_v28, 5  ;;  %v4422_v28 = vld [vmem:[#allocation2 + $0x5c] sm:$0x1] }
 0x167   : > { %3427 = vmatmul.msk.bf16.gmra.mxu0 %vm1168_vm12, %v2643_v9  ;;  %v4356_v10 = vrot.slane %v1869_v3, 5  ;;  %v1875_v5 = vrot.slane %v1873_v44, 4  ;;  %v1941_v9 = vunpack.c.l.b16 %v1858_v38  ;;  %v2567_v34 = vrot.slane %v2565_v6, 4  ;;  %v1733_v38 = vld [vmem:[#allocation2 + $0x54] sm:$0xf] }
 0x168   : > { %v1221_v26 = vpop.f32.mrf.mxu2  ;;  %v1884_v55 = vshrl.u32 %v1733_v38, 16  ;;  %v2053_v6 = vld [vmem:[#allocation2 + $0x48] sm:$0xe] }
 0x169   : > { %v1876_v0 = vor.u32 %v1875_v5, %v4356_v10  ;;  %v1952_v44 = vpack.c.b16 %v1941_v9, %v1940_v8  ;;  %v1872_v52 = vsel %vm3820_vm15, %v1867_v50, %v4356_v10  ;;  %v1887_v8 = vshll.u32 %v1733_v38, 16  ;;  %v3476_v10 = vld [vmem:[#allocation2 + $0x18] sm:$0xff] }
 0x16a   : > { %v1942_v29 = vunpack.c.l.b16 %v1872_v52 }
 0x16b   : > { %v1216_v31 = vpop.f32.mrf.mxu1  ;;  %3379 = vmatmul.msk.bf16.gmra.mxu3 %vm1168_vm12, %v2156_v11 }
 0x16c   : > { %v4346_v54 = vadd.f32 %v4301_v61, %v1216_v31  ;;  %v2112_v61 = vrot.slane %v2110_v30, 4  ;;  %v1877_v31 = vrot.slane %v1876_v0, 4 }
 0x16e   : > { %3319 = vmatmul.msk.bf16.gmra.mxu1 %vm1168_vm12, %v1469_v59  ;;  %v1337_v47 = vpop.f32.mrf.mxu3  ;;  %v2114_v22 = vsel %vm4008_vm4, %v2112_v61, %v2113_v48  ;;  %v1881_v48 = vrot.slane %v1879_v46, 5  ;;  %v2120_v46 = vrot.slane %v4359_v62, 5 }
 0x16f   : > { %v4368_v1 = vadd.f32 %v1337_v47, %v1221_v26  ;;  %v2111_v26 = vsel %vm4008_vm4, %v3372_v15, %v2110_v30  ;;  %v2146_v11 = vunpack.c.l.b16 %v2114_v22  ;;  %v4391_v30 = vld [vmem:[#allocation2 + $0x58] sm:$0xf]  ;;  %v2117_v47 = vrot.slane %v4331_v4, 5  ;;  %v2425_v4 = vld [vmem:[#allocation2 + $0x60] sm:$0xf] }
 0x170   : > { %v1223_v56 = vpop.f32.mrf.mxu2  ;;  %v2145_v49 = vunpack.c.l.b16 %v2111_v26  ;;  %v1882_v5 = vsel %vm3820_vm15, %v1877_v31, %v1881_v48  ;;  %v1893_v9 = vshll.u32 %v4391_v30, 16  ;;  %v1897_v15 = vshrl.u32 %v4391_v30, 16  ;;  %v4418_v48 = vpop.f32.mrf.mxu0 }
 0x171   : > { %v1943_v0 = vunpack.c.l.b16 %v1882_v5  ;;  %v2576_v35 = vshrl.u32 %v2425_v4, 16  ;;  %v2579_v60 = vshll.u32 %v2425_v4, 16 }
 0x172   : > { %v2157_v18 = vpack.c.b16 %v2146_v11, %v2145_v49  ;;  %v1889_v11 = vrot.slane %v1887_v8, 5  ;;  %v4416_v50 = vrot.slane %v1893_v9, 5  ;;  %v1899_v31 = vrot.slane %v1897_v15, 4  ;;  %v2748_v8 = vld [vmem:[#allocation2 + $0x48] sm:$0xe] }
 0x173   : > { %v1218_v25 = vpop.f32.mrf.mxu1  ;;  %v1953_v33 = vpack.c.b16 %v1943_v0, %v1942_v29  ;;  %v3436_v15 = vrot.slane %v2748_v8, 9 }
 0x174   : > { %v4379_v3 = vadd.f32 %v4333_v23, %v1218_v25  ;;  %v2568_v23 = vor.u32 %v2567_v34, %v4376_v45  ;;  %v3373_v25 = vrot.slane %v2053_v6, 9  ;;  %v2119_v34 = vrot.slane %v2117_v47, 4 }
 0x175   : > { %3364 = vmatmul.msk.bf16.gmra.mxu2 %vm1168_vm12, %v1952_v44  ;;  %v1886_v44 = vrot.slane %v1884_v55, 4  ;;  %v1903_v6 = vshll.u32 %v4422_v28, 16 }
 0x176   : > { %v1339_v59 = vpop.f32.mrf.mxu3  ;;  %v2569_v63 = vrot.slane %v2568_v23, 4  ;;  %v2118_v5 = vsel %vm4008_vm4, %v3373_v25, %v2117_v47  ;;  %v2121_v55 = vsel %vm4008_vm4, %v2119_v34, %v2120_v46  ;;  %v2809_v47 = vrot.slane %v4324_v57, 5 }
 0x177   : > { %v4388_v21 = vadd.f32 %v1339_v59, %v1223_v56  ;;  %3428 = vmatmul.msk.bf16.gmra.mxu0 %vm1168_vm12, %v2644_v20  ;;  %v4406_v56 = vld [vmem:[#allocation2 + $0x64] sm:$0xf]  ;;  %v2578_v59 = vrot.slane %v2576_v35, 4  ;;  %v2147_v29 = vunpack.c.l.b16 %v2118_v5  ;;  %v2148_v35 = vunpack.c.l.b16 %v2121_v55 }
 0x178   : > { %v1226_v61 = vpop.f32.mrf.mxu2  ;;  %v2585_v12 = vshll.u32 %v4406_v56, 16  ;;  %v2589_v24 = vshrl.u32 %v4406_v56, 16  ;;  %v2574_v62 = vsel %vm3820_vm15, %v2569_v63, %v2573_v19  ;;  %v2806_v19 = vrot.slane %v4291_v14, 5  ;;  %v3477_v5 = vld [vmem:[#allocation2 + $0x24] sm:$0xff] }
 0x179   : > { %v2635_v52 = vunpack.c.l.b16 %v2574_v62  ;;  %v1900_v63 = vor.u32 %v1899_v31, %v4416_v50  ;;  %v2124_v62 = vrot.slane %v4391_v30, 5 }
 0x17a   : > { %v4424_v49 = vrot.slane %v2585_v12, 5  ;;  %v2591_v23 = vrot.slane %v2589_v24, 4 }
 0x17b   : > { %v1506_v36 = vpop.f32.mrf.mxu1  ;;  %3380 = vmatmul.msk.bf16.gmra.mxu3 %vm1168_vm12, %v2157_v18  ;;  %v1901_v34 = vrot.slane %v1900_v63, 4  ;;  %v2126_v55 = vrot.slane %v2124_v62, 4  ;;  %v4462_v63 = vld [vmem:[#allocation2 + $0x64] sm:$0xf] }
 0x17c   : > { %v4402_v22 = vadd.f32 %v1506_v36, %v4240_v7  ;;  %v2564_v7 = vsel %vm3820_vm15, %v2559_v37, %v4376_v45  ;;  %v2581_v45 = vrot.slane %v2579_v60, 5  ;;  %v4428_v37 = vld [vmem:[#allocation2 + $0x68] sm:$0x1]  ;;  %v1890_v36 = vor.u32 %v1889_v11, %v1886_v44 }
 0x17d   : > { %v2634_v18 = vunpack.c.l.b16 %v2564_v7  ;;  %v2592_v14 = vor.u32 %v2591_v23, %v4424_v49  ;;  %v2595_v4 = vshll.u32 %v4428_v37, 16  ;;  %v2807_v60 = vsel %vm4008_vm4, %v3436_v15, %v2806_v19  ;;  %v4452_v23 = vpop.f32.mrf.mxu0  ;;  %v2428_v15 = vld [vmem:[#allocation2 + $0x6c] sm:$0xf] }
 0x17e   : > { %3416 = vmatmul.msk.bf16.vlgmr.msrb.gmra.mxu1 %vm1168_vm12, %v3476_v10  ;;  %v1342_v26 = vpop.f32.mrf.mxu3  ;;  %v2808_v10 = vrot.slane %v2806_v19, 4  ;;  %v2582_v0 = vor.u32 %v2581_v45, %v2578_v59  ;;  %v1891_v24 = vrot.slane %v1890_v36, 4  ;;  %v2841_v7 = vunpack.c.l.b16 %v2807_v60  ;;  %v1736_v36 = vld [vmem:[#allocation2 + $0x60] sm:$0xf] }
 0x17f   : > { %v4420_v20 = vadd.f32 %v1342_v26, %v1226_v61  ;;  %v2645_v46 = vpack.c.b16 %v2635_v52, %v2634_v18  ;;  %v1905_v44 = vrot.slane %v1903_v6, 5  ;;  %v2054_v26 = vld [vmem:[#allocation2 + $0x54] sm:$0xe]  ;;  %v2593_v31 = vrot.slane %v2592_v14, 4 }
 0x180   : > { %v1228_v38 = vpop.f32.mrf.mxu2  ;;  %v2810_v12 = vsel %vm4008_vm4, %v2808_v10, %v2809_v47  ;;  %v2583_v11 = vrot.slane %v2582_v0, 4  ;;  %v2597_v59 = vrot.slane %v2595_v4, 5  ;;  %v2158_v18 = vpack.c.b16 %v2148_v35, %v2147_v29  ;;  %v4474_v29 = vld [vmem:[#allocation2 + $0x70] sm:$0xf] }
 0x181   : > { %v2842_v57 = vunpack.c.l.b16 %v2810_v12  ;;  %v1896_v30 = vsel %vm3820_vm15, %v1891_v24, %v4416_v50  ;;  %v1906_v6 = vsel %vm3820_vm15, %v1901_v34, %v1905_v44  ;;  %v1908_v50 = vshrl.u32 %v1736_v36, 16  ;;  %v4484_v44 = vld [vmem:[#allocation2 + $0x68] sm:$0x1] }
 0x182   : > { %v2598_v8 = vsel %vm3820_vm15, %v2593_v31, %v2597_v59  ;;  %v1911_v10 = vshll.u32 %v1736_v36, 16  ;;  %v1921_v47 = vshrl.u32 %v4462_v63, 16  ;;  %v1944_v14 = vunpack.c.l.b16 %v1896_v30 }
 0x183   : > { %v1508_v61 = vpop.f32.mrf.mxu1  ;;  %v4450_v45 = vpack.c.b16 %v2842_v57, %v2841_v7  ;;  %v1945_v35 = vunpack.c.l.b16 %v1906_v6  ;;  %v2603_v12 = vshll.u32 %v2428_v15, 16  ;;  %v2637_v24 = vunpack.c.l.b16 %v2598_v8 }
 0x184   : > { %v4436_v9 = vadd.f32 %v1508_v61, %v4266_v43  ;;  %v2127_v61 = vrot.slane %v4422_v28, 5  ;;  %v1917_v28 = vshll.u32 %v4462_v63, 16  ;;  %v2609_v7 = vshll.u32 %v4474_v29, 16 }
 0x185   : > { %3365 = vmatmul.msk.bf16.gmra.mxu2 %vm1168_vm12, %v1953_v33  ;;  %v2613_v57 = vshrl.u32 %v4474_v29, 16  ;;  %v1923_v31 = vrot.slane %v1921_v47, 4  ;;  %v4488_v30 = vpop.f32.mrf.mxu0  ;;  %v1954_v36 = vpack.c.b16 %v1945_v35, %v1944_v14  ;;  %v1927_v8 = vshll.u32 %v4484_v44, 16 }
 0x186   : > { %v1344_v43 = vpop.f32.mrf.mxu3  ;;  %v2128_v60 = vsel %vm4008_vm4, %v2126_v55, %v2127_v61  ;;  %v2749_v55 = vld [vmem:[#allocation2 + $0x54] sm:$0xe]  ;;  %v2131_v35 = vrot.slane %v4462_v63, 5 }
 0x187   : > { %v4446_v25 = vadd.f32 %v1344_v43, %v1228_v38  ;;  %3429 = vmatmul.msk.bf16.gmra.mxu0 %vm1168_vm12, %v2645_v46  ;;  %v3374_v38 = vrot.slane %v2054_v26, 9  ;;  %v1910_v26 = vrot.slane %v1908_v50, 4 }
 0x188   : > { %v1231_v33 = vpop.f32.mrf.mxu2 }
 0x189   : > { %v2125_v4 = vsel %vm4008_vm4, %v3374_v38, %v2124_v62  ;;  %v1919_v62 = vrot.slane %v1917_v28, 5  ;;  %v2615_v38 = vrot.slane %v2613_v57, 4 }
 0x18a   : > { %v2149_v6 = vunpack.c.l.b16 %v2125_v4  ;;  %v1929_v4 = vrot.slane %v1927_v8, 5 }
 0x18b   : > { %v1511_v52 = vpop.f32.mrf.mxu1  ;;  %3381 = vmatmul.msk.bf16.gmra.mxu3 %vm1168_vm12, %v2158_v18 }
 0x18c   : > { %v4455_v19 = vadd.f32 %v1511_v52, %v4288_v16  ;;  %v2588_v16 = vsel %vm3820_vm15, %v2583_v11, %v4424_v49  ;;  %v2600_v49 = vshrl.u32 %v2428_v15, 16  ;;  %v1913_v11 = vrot.slane %v1911_v10, 5 }
 0x18d   : > { %v2636_v43 = vunpack.c.l.b16 %v2588_v16  ;;  %v2605_v52 = vrot.slane %v2603_v12, 5  ;;  %v2150_v16 = vunpack.c.l.b16 %v2128_v60  ;;  %v1924_v10 = vor.u32 %v1923_v31, %v1919_v62 }
 0x18e   : > { %3417 = vmatmul.msk.bf16.gmra.mxu1 %vm1168_vm12, %v3477_v5  ;;  %v1347_v0 = vpop.f32.mrf.mxu3  ;;  %v2602_v18 = vrot.slane %v2600_v49, 4  ;;  %v2611_v5 = vrot.slane %v2609_v7, 5  ;;  %v1914_v50 = vor.u32 %v1913_v11, %v1910_v26  ;;  %v3437_v12 = vrot.slane %v2749_v55, 9  ;;  %v3478_v55 = vld [vmem:[#allocation2 + $0x30] sm:$0xff] }
 0x18f   : > { %v4478_v46 = vadd.f32 %v1347_v0, %v1231_v33  ;;  %v4486_v33 = vld [vmem:[#allocation2 + $0x74] sm:$0x1]  ;;  %v2646_v15 = vpack.c.b16 %v2637_v24, %v2636_v43  ;;  %v2159_v14 = vpack.c.b16 %v2150_v16, %v2149_v6  ;;  %v1925_v57 = vrot.slane %v1924_v10, 4  ;;  %v4510_v6 = vpop.f32.mrf.mxu0 }
 0x190   : > { %v1233_v34 = vpop.f32.mrf.mxu2  ;;  %v2619_v28 = vshll.u32 %v4486_v33, 16  ;;  %v2606_v0 = vor.u32 %v2605_v52, %v2602_v18  ;;  %v2616_v49 = vor.u32 %v2615_v38, %v2611_v5  ;;  %v1915_v24 = vrot.slane %v1914_v50, 4  ;;  %v2055_v18 = vld [vmem:[#allocation2 + $0x60] sm:$0xe] }
 0x191   : > { %v2816_v11 = vrot.slane %v4374_v2, 5  ;;  %v1930_v16 = vsel %vm3820_vm15, %v1925_v57, %v1929_v4  ;;  %v3375_v8 = vrot.slane %v2055_v18, 9  ;;  %v3569_v18 = vld [vmem:[#allocation2 + $0x20] sm:$0x1] }
 0x192   : > { %v1920_v2 = vsel %vm3820_vm15, %v1915_v24, %v1919_v62  ;;  %v1947_v62 = vunpack.c.l.b16 %v1930_v16 }
 0x193   : > { %v1513_v59 = vpop.f32.mrf.mxu1 }
 0x194   : > { %v4491_v61 = vadd.f32 %v1513_v59, %v4321_v17  ;;  %v2813_v17 = vrot.slane %v4354_v53, 5  ;;  %v2607_v59 = vrot.slane %v2606_v0, 4  ;;  %v2617_v53 = vrot.slane %v2616_v49, 4 }
 0x195   : > { %3366 = vmatmul.msk.bf16.gmra.mxu2 %vm1168_vm12, %v1954_v36  ;;  %v1946_v49 = vunpack.c.l.b16 %v1920_v2 }
 0x196   : > { %v1349_v47 = vpop.f32.mrf.mxu3  ;;  %v2814_v60 = vsel %vm4008_vm4, %v3437_v12, %v2813_v17  ;;  %v2815_v26 = vrot.slane %v2813_v17, 4  ;;  %v2612_v50 = vsel %vm3820_vm15, %v2607_v59, %v2611_v5 }
 0x197   : > { %v4497_v7 = vadd.f32 %v1349_v47, %v1233_v34  ;;  %3430 = vmatmul.msk.bf16.gmra.mxu0 %vm1168_vm12, %v2646_v15  ;;  %v2621_v34 = vrot.slane %v2619_v28, 5  ;;  %v2843_v52 = vunpack.c.l.b16 %v2814_v60  ;;  %v2134_v28 = vrot.slane %v4484_v44, 5 }
 0x198   : > { %v1236_v43 = vpop.f32.mrf.mxu2  ;;  %v2817_v63 = vsel %vm4008_vm4, %v2815_v26, %v2816_v11  ;;  %v2638_v17 = vunpack.c.l.b16 %v2612_v50  ;;  %v2132_v60 = vsel %vm4008_vm4, %v3375_v8, %v2131_v35  ;;  %v1955_v44 = vpack.c.b16 %v1947_v62, %v1946_v49  ;;  %v4534_v11 = vpop.f32.mrf.mxu0 }
 0x199   : > { %v2844_v36 = vunpack.c.l.b16 %v2817_v63  ;;  %v2622_v10 = vsel %vm3820_vm15, %v2617_v53, %v2621_v34  ;;  %v2151_v57 = vunpack.c.l.b16 %v2132_v60 }
 0x19b   : > { %v1516_v31 = vpop.f32.mrf.mxu1  ;;  %3382 = vmatmul.msk.bf16.gmra.mxu3 %vm1168_vm12, %v2159_v14  ;;  %v4522_v47 = vpack.c.b16 %v2844_v36, %v2843_v52  ;;  %v2639_v14 = vunpack.c.l.b16 %v2622_v10  ;;  %v3479_v36 = vld [vmem:[#allocation2 + $0x3c] sm:$0xff] }
 0x19c   : > { %v4505_v38 = vadd.f32 %v1516_v31, %v4346_v54  ;;  %v2133_v54 = vrot.slane %v2131_v35, 4  ;;  %v3568_v35 = vld [vmem:[#allocation2 + $0x1c] sm:$0xf] }
 0x19d   : > { %v2647_v24 = vpack.c.b16 %v2639_v14, %v2638_v17  ;;  %v2778_v59 = vrot.slane %v3568_v35, 5  ;;  %v2745_v35 = vld [vmem:[#allocation2 + $0x24] sm:$0xe] }
 0x19e   : > { %3418 = vmatmul.msk.bf16.gmra.mxu1 %vm1168_vm12, %v3478_v55  ;;  %v1352_v15 = vpop.f32.mrf.mxu3  ;;  %v2135_v5 = vsel %vm4008_vm4, %v2133_v54, %v2134_v28  ;;  %v2744_v55 = vld [vmem:[#allocation2 + $0x18] sm:$0xe] }
 0x19f   : > { %v4524_v0 = vadd.f32 %v1352_v15, %v1236_v43  ;;  %v2152_v43 = vunpack.c.l.b16 %v2135_v5  ;;  %v2780_v2 = vrot.slane %v2778_v59, 4  ;;  %v3432_v16 = vrot.slane %v2744_v55, 9 }
 0x1a0   : > { %v1238_v12 = vpop.f32.mrf.mxu2  ;;  %v1699_v5 = vadd.f32 %v4312_v41, %v4402_v22  ;;  %v1700_v22 = vadd.f32 %v4343_v40, %v4436_v9  ;;  %v2795_v40 = vrot.slane %v4228_v58, 5  ;;  %v1702_v58 = vadd.f32 %v4418_v48, %v4491_v61 }
 0x1a1   : > { %v2160_v34 = vpack.c.b16 %v2152_v43, %v2151_v57  ;;  %v2779_v50 = vsel %vm4008_vm4, %v3432_v16, %v2778_v59  ;;  %v3480_v59 = vld [vmem:[#allocation2 + $0x48] sm:$0xff]  ;;  %v2802_v48 = vrot.slane %v4264_v39, 5 }
 0x1a2   : > { %v2833_v49 = vunpack.c.l.b16 %v2779_v50  ;;  %v1679_v50 = vpop.f32.mrf.mxu0 }
 0x1a3   : > { %v1518_v4 = vpop.f32.mrf.mxu1 }
 0x1a4   : > { %v4531_v32 = vadd.f32 %v1518_v4, %v4379_v3  ;;  %v2781_v3 = vrot.slane %v3569_v18, 5  ;;  %v3570_v4 = vld [vmem:[#allocation2 + $0x28] sm:$0xf] }
 0x1a5   : > { %3367 = vmatmul.msk.bf16.gmra.mxu2 %vm1168_vm12, %v1955_v44  ;;  %v2785_v60 = vrot.slane %v3570_v4, 5 }
 0x1a6   : > { %v1354_v26 = vpop.f32.mrf.mxu3  ;;  %v2782_v8 = vsel %vm4008_vm4, %v2780_v2, %v2781_v3  ;;  %v1704_v39 = vadd.f32 %v4488_v30, %v4531_v32  ;;  %v3483_v32 = vld [vmem:[#allocation2 + $0x6c] sm:$0xff] }
 0x1a7   : > { %v4536_v31 = vadd.f32 %v1354_v26, %v1238_v12  ;;  %3431 = vmatmul.msk.bf16.gmra.mxu0 %vm1168_vm12, %v2647_v24  ;;  %v2834_v10 = vunpack.c.l.b16 %v2782_v8  ;;  %v3571_v24 = vld [vmem:[#allocation2 + $0x2c] sm:$0x1]  ;;  %v2792_v8 = vrot.slane %v4211_v13, 5 }
 0x1a8   : > { %v1241_v53 = vpop.f32.mrf.mxu2  ;;  %v2788_v57 = vrot.slane %v3571_v24, 5 }
 0x1a9   : > { %v2849_v12 = vpack.c.b16 %v2834_v10, %v2833_v49 }
 0x1ab   : > { %v1521_v52 = vpop.f32.mrf.mxu1  ;;  %3383 = vmatmul.msk.bf16.gmra.mxu3 %vm1168_vm12, %v2160_v34  ;;  %v3433_v34 = vrot.slane %v2745_v35, 9  ;;  %v1703_v35 = vadd.f32 %v4452_v23, %v4505_v38 }
 0x1ac   : > { %v4540_v63 = vadd.f32 %v1521_v52, %v4368_v1 }
 0x1ad   : > { %v2786_v41 = vsel %vm4008_vm4, %v3433_v34, %v2785_v60  ;;  %v2747_v34 = vld [vmem:[#allocation2 + $0x3c] sm:$0xe] }
 0x1ae   : > { %3419 = vmatmul.msk.bf16.gmra.mxu1 %vm1168_vm12, %v3479_v36  ;;  %v1357_v54 = vpop.f32.mrf.mxu3 }
 0x1af   : > { %v4546_v15 = vadd.f32 %v1357_v54, %v1241_v53  ;;  %v2787_v53 = vrot.slane %v2785_v60, 4  ;;  %v1701_v54 = vadd.f32 %v4383_v42, %v4455_v19 }
 0x1b0   : > { %v1243_v28 = vpop.f32.mrf.mxu2 }
 0x1b1   : > { %v2789_v18 = vsel %vm4008_vm4, %v2787_v53, %v2788_v57 }
 0x1b2   : > { %v2836_v3 = vunpack.c.l.b16 %v2789_v18 }
 0x1b3   : > { %v1523_v1 = vpop.f32.mrf.mxu1 }
 0x1b4   : > { %v4551_v62 = vadd.f32 %v1523_v1, %v4388_v21  ;;  %v2746_v1 = vld [vmem:[#allocation2 + $0x30] sm:$0xe] }
 0x1b5   : > { %3440 = vmatmul.msk.bf16.vlgmr.msra.gmra.mxu2 %vm1168_vm12, %v2849_v12  ;;  %v2794_v12 = vrot.slane %v2792_v8, 4 }
 0x1b6   : > { %v1359_v17 = vpop.f32.mrf.mxu3 }
 0x1b7   : > { %v4554_v14 = vadd.f32 %v1359_v17, %v1243_v28  ;;  %v3434_v17 = vrot.slane %v2746_v1, 9  ;;  %v2796_v13 = vsel %vm4008_vm4, %v2794_v12, %v2795_v40 }
 0x1b8   : > { %v1992_v44 = vpop.f32.mrf.mxu2  ;;  %v2838_v19 = vunpack.c.l.b16 %v2796_v13 }
 0x1b9   : > { %v4558_v26 = vadd.f32 %v1992_v44, %v1699_v5  ;;  %v2793_v42 = vsel %vm4008_vm4, %v3434_v17, %v2792_v8  ;;  %v1681_v44 = vpop.f32.mrf.mxu0 }
 0x1bb   : > { %v1526_v43 = vpop.f32.mrf.mxu1 }
 0x1bc   : > { %v4561_v21 = vadd.f32 %v1526_v43, %v4420_v20  ;;  %v2835_v20 = vunpack.c.l.b16 %v2786_v41  ;;  %v2799_v43 = vrot.slane %v4245_v51, 5  ;;  %v3482_v41 = vld [vmem:[#allocation2 + $0x60] sm:$0xff] }
 0x1be   : > { %3420 = vmatmul.msk.bf16.gmra.mxu1 %vm1168_vm12, %v3480_v59  ;;  %v2850_v16 = vpack.c.b16 %v2836_v3, %v2835_v20  ;;  %v3435_v3 = vrot.slane %v2747_v34, 9 }
 0x1c0   : > { %v1994_v52 = vpop.f32.mrf.mxu2  ;;  %v2800_v23 = vsel %vm4008_vm4, %v3435_v3, %v2799_v43 }
 0x1c1   : > { %v4570_v36 = vadd.f32 %v1994_v52, %v1700_v22  ;;  %v1684_v22 = vpop.f32.mrf.mxu0  ;;  %v2839_v20 = vunpack.c.l.b16 %v2800_v23 }
 0x1c3   : > { %v1528_v55 = vpop.f32.mrf.mxu1 }
 0x1c4   : > { %v4573_v2 = vadd.f32 %v1528_v55, %v4446_v25  ;;  %v3481_v25 = vld [vmem:[#allocation2 + $0x54] sm:$0xff] }
 0x1c5   : > { %3441 = vmatmul.msk.bf16.gmra.mxu2 %vm1168_vm12, %v2850_v16 }
 0x1c8   : > { %v1997_v10 = vpop.f32.mrf.mxu2 }
 0x1c9   : > { %v4580_v28 = vadd.f32 %v1997_v10, %v1701_v54  ;;  %v1686_v54 = vpop.f32.mrf.mxu0  ;;  %v1705_v10 = vadd.f32 %v4510_v6, %v4540_v63  ;;  %v1707_v6 = vadd.f32 %v1679_v50, %v4561_v21 }
 0x1cb   : > { %v1531_v9 = vpop.f32.mrf.mxu1 }
 0x1cc   : > { %v4583_v49 = vadd.f32 %v1531_v9, %v4478_v46  ;;  %v2837_v46 = vunpack.c.l.b16 %v2793_v42 }
 0x1ce   : > { %3421 = vmatmul.msk.bf16.gmra.mxu1 %vm1168_vm12, %v3481_v25  ;;  %v2851_v57 = vpack.c.b16 %v2838_v19, %v2837_v46  ;;  %v1706_v25 = vadd.f32 %v4534_v11, %v4551_v62  ;;  %v1708_v19 = vadd.f32 %v1681_v44, %v4573_v2 }
 0x1d0   : > { %v1999_v4 = vpop.f32.mrf.mxu2 }
 0x1d1   : > { %v4592_v5 = vadd.f32 %v1999_v4, %v1702_v58 }
 0x1d3   : > { %v1533_v60 = vpop.f32.mrf.mxu1 }
 0x1d4   : > { %v1557_v24 = vadd.f32 %v1533_v60, %v4497_v7  ;;  %v2801_v7 = vrot.slane %v2799_v43, 4  ;;  %v2820_v60 = vrot.slane %v4406_v56, 5 }
 0x1d5   : > { %3442 = vmatmul.msk.bf16.gmra.mxu2 %vm1168_vm12, %v2851_v57  ;;  %v2823_v57 = vrot.slane %v4428_v37, 5  ;;  %v2827_v37 = vrot.slane %v4474_v29, 5 }
 0x1d6   : > { %v2803_v51 = vsel %vm4008_vm4, %v2801_v7, %v2802_v48  ;;  %v2822_v50 = vrot.slane %v2820_v60, 4  ;;  %v2201_v48 = vpop.f32.mrf.mxu3  ;;  %v2751_v7 = vld [vmem:[#allocation2 + $0x6c] sm:$0xe] }
 0x1d7   : > { %v2840_v38 = vunpack.c.l.b16 %v2803_v51  ;;  %v3439_v23 = vrot.slane %v2751_v7, 9 }
 0x1d8   : > { %v2002_v59 = vpop.f32.mrf.mxu2  ;;  %v2824_v44 = vsel %vm4008_vm4, %v2822_v50, %v2823_v57  ;;  %v3485_v57 = vld [vmem:[%s3692_s12] sm:$0xff]  }
 0x1d9   : > { %v4600_v53 = vadd.f32 %v2002_v59, %v1703_v35  ;;  %v2852_v8 = vpack.c.b16 %v2840_v38, %v2839_v20  ;;  %v1710_v35 = vadd.f32 %v1686_v54, %v1557_v24  ;;  %v2830_v24 = vrot.slane %v4486_v33, 5 }
 0x1da   : > { %v2828_v20 = vsel %vm4008_vm4, %v3439_v23, %v2827_v37 }
 0x1db   : > { %v1536_v61 = vpop.f32.mrf.mxu1  ;;  %v2847_v54 = vunpack.c.l.b16 %v2828_v20 }
 0x1dc   : > { %v4603_v18 = vadd.f32 %v1536_v61, %v4524_v0 }
 0x1de   : > { %3422 = vmatmul.msk.bf16.gmra.mxu1 %vm1168_vm12, %v3482_v41 }
 0x1e0   : > { %v2004_v52 = vpop.f32.mrf.mxu2 }
 0x1e1   : > { %v4612_v0 = vadd.f32 %v2004_v52, %v1704_v39  ;;  %v2829_v39 = vrot.slane %v2827_v37, 4  ;;  %v2203_v52 = vpop.f32.mrf.mxu3 }
 0x1e3   : > { %v1538_v55 = vpop.f32.mrf.mxu1  ;;  %v2831_v29 = vsel %vm4008_vm4, %v2829_v39, %v2830_v24 }
 0x1e4   : > { %v1559_v16 = vadd.f32 %v1538_v55, %v4536_v31  ;;  %v1689_v31 = vpop.f32.mrf.mxu0 }
 0x1e5   : > { %3443 = vmatmul.msk.bf16.gmra.mxu2 %vm1168_vm12, %v2852_v8 }
 0x1e8   : > { %v2007_v40 = vpop.f32.mrf.mxu2 }
 0x1e9   : > { %v4618_v1 = vadd.f32 %v2007_v40, %v1705_v10  ;;  %v2848_v10 = vunpack.c.l.b16 %v2831_v29 }
 0x1eb   : > { %v1541_v9 = vpop.f32.mrf.mxu1 }
 0x1ec   : > { %v1560_v30 = vadd.f32 %v1541_v9, %v4546_v15  ;;  %v1691_v58 = vpop.f32.mrf.mxu0 }
 0x1ed   : > { %v1712_v8 = vadd.f32 %v1691_v58, %v1559_v16 }
 0x1ee   : > { %3423 = vmatmul.msk.bf16.gmra.mxu1 %vm1168_vm12, %v3483_v32  ;;  %v2856_v32 = vpack.c.b16 %v2848_v10, %v2847_v54 }
 0x1f0   : > { %v2009_v12 = vpop.f32.mrf.mxu2 }
 0x1f1   : > { %v4624_v13 = vadd.f32 %v2009_v12, %v1706_v25  ;;  %v2206_v25 = vpop.f32.mrf.mxu3 }
 0x1f3   : > { %v1543_v17 = vpop.f32.mrf.mxu1 }
 0x1f4   : > { %v1561_v42 = vadd.f32 %v1543_v17, %v4554_v14  ;;  %v1694_v62 = vpop.f32.mrf.mxu0  ;;  %v2750_v14 = vld [vmem:[#allocation2 + $0x60] sm:$0xe] }
 0x1f5   : > { %3444 = vmatmul.msk.bf16.gmra.mxu2 %vm1168_vm12, %v4450_v45  ;;  %v1709_v45 = vadd.f32 %v1684_v22, %v4583_v49  ;;  %v3438_v21 = vrot.slane %v2750_v14, 9  ;;  %v1711_v22 = vadd.f32 %v1689_v31, %v4603_v18  ;;  %v1713_v31 = vadd.f32 %v1694_v62, %v1560_v30  ;;  %v4669_v30 = vld [vmem:[%s4769_s5] ss:$0 sm:$0xff] }
 0x1f7   : > { %v2821_v2 = vsel %vm4008_vm4, %v3438_v21, %v2820_v60  ;;  %v2242_v21 = vadd.f32 %v2203_v52, %v4570_v36 }
 0x1f8   : > { %v2012_v63 = vpop.f32.mrf.mxu2  ;;  %v2845_v59 = vunpack.c.l.b16 %v2821_v2 }
 0x1f9   : > { %v4630_v15 = vadd.f32 %v2012_v63, %v1707_v6  ;;  %v2208_v27 = vpop.f32.mrf.mxu3 }
 0x1fa   : > { %v2244_v52 = vadd.f32 %v2208_v27, %v4592_v5 }
 0x1fb   : > { %v2351_v34 = vpop.f32.mrf.mxu1 }
 0x1fc   : > { %v1696_v56 = vpop.f32.mrf.mxu0 }
 0x1fd   : > { %v1714_v63 = vadd.f32 %v1696_v56, %v1561_v42  ;;  %v3486_v56 = vunpack.c.l.bf16 %v3485_v57 }
 0x200   : > { %v2014_v4 = vpop.f32.mrf.mxu2 }
 0x201   : > { %v4633_v11 = vadd.f32 %v2014_v4, %v1708_v19  ;;  %v2241_v19 = vadd.f32 %v2201_v48, %v4558_v26  ;;  %v2211_v62 = vpop.f32.mrf.mxu3 }
 0x202   : > { %v2245_v5 = vadd.f32 %v2211_v62, %v4600_v53 }
 0x203   : > { %v2353_v55 = vpop.f32.mrf.mxu1  ;;  %v2391_v60 = vadd.f32 %v2351_v34, %v2241_v19 }
 0x204   : > { %v2688_v3 = vpop.f32.mrf.mxu0  ;;  %v2392_v2 = vadd.f32 %v2353_v55, %v2242_v21 }
 0x205   : > { %3445 = vmatmul.msk.bf16.gmra.mxu2 %vm1168_vm12, %v4522_v47  ;;  %v2846_v47 = vunpack.c.l.b16 %v2824_v44 }
 0x207   : > { %v2855_v41 = vpack.c.b16 %v2846_v47, %v2845_v59 }
 0x208   : > { %v2017_v46 = vpop.f32.mrf.mxu2 }
 0x209   : > { %v4640_v43 = vadd.f32 %v2017_v46, %v1709_v45  ;;  %v2728_v45 = vadd.f32 %v2688_v3, %v2391_v60  ;;  %v2213_v37 = vpop.f32.mrf.mxu3 }
 0x20a   : > { %v2246_v53 = vadd.f32 %v2213_v37, %v4612_v0 }
 0x20b   : > { %v2356_v33 = vpop.f32.mrf.mxu1 }
 0x20c   : > { %v2690_v9 = vpop.f32.mrf.mxu0 }
 0x20d   : > { %v2729_v59 = vadd.f32 %v2690_v9, %v2392_v2 }
 0x210   : > { %v2019_v61 = vpop.f32.mrf.mxu2 }
 0x211   : > { %v4646_v49 = vadd.f32 %v2019_v61, %v1710_v35  ;;  %v2243_v61 = vadd.f32 %v2206_v25, %v4580_v28  ;;  %v2216_v9 = vpop.f32.mrf.mxu3 }
 0x213   : > { %v2358_v16 = vpop.f32.mrf.mxu1  ;;  %v2393_v36 = vadd.f32 %v2356_v33, %v2243_v61 }
 0x214   : > { %v2693_v6 = vpop.f32.mrf.mxu0  ;;  %v2394_v54 = vadd.f32 %v2358_v16, %v2244_v52 }
 0x215   : > { %3446 = vmatmul.msk.bf16.gmra.mxu2 %vm1168_vm12, %v2855_v41  ;;  %v2730_v39 = vadd.f32 %v2693_v6, %v2393_v36 }
 0x218   : > { %v2022_v51 = vpop.f32.mrf.mxu2 }
 0x219   : > { %v4652_v38 = vadd.f32 %v2022_v51, %v1711_v22  ;;  %v3487_v51 = vunpack.c.h.bf16 %v3485_v57  ;;  %v2218_v21 = vpop.f32.mrf.mxu3 }
 0x21b   : > { %v2361_v50 = vpop.f32.mrf.mxu1 }
 0x21c   : > { %v2695_v14 = vpop.f32.mrf.mxu0 }
 0x220   : > { %v2024_v18 = vpop.f32.mrf.mxu2 }
 0x221   : > { %v4658_v40 = vadd.f32 %v2024_v18, %v1712_v8  ;;  %v3516_v8 = vld [vmem:[%s3692_s12 + $0x8] sm:$0xff]  }
 0x222   : > { %v3490_v25 = vunpack.c.l.bf16 %v3516_v8 }
 0x223   : > { %v2363_v3 = vpop.f32.mrf.mxu1 }
 0x224   : > { %v2698_v47 = vpop.f32.mrf.mxu0 }
 0x225   : > { %3447 = vmatmul.msk.bf16.gmra.mxu2 %vm1168_vm12, %v2856_v32 }
 0x228   : > { %v2027_v12 = vpop.f32.mrf.mxu2 }
 0x229   : > { %v4661_v17 = vadd.f32 %v2027_v12, %v1713_v31  ;;  %v2731_v12 = vadd.f32 %v2695_v14, %v2394_v54 }
 0x22b   : > { %v2366_v33 = vpop.f32.mrf.mxu1 }
 0x22c   : > { %v2700_v29 = vpop.f32.mrf.mxu0 }
 0x230   : > { %v2029_v58 = vpop.f32.mrf.mxu2 }
 0x231   : > { %v4664_v4 = vadd.f32 %v2029_v58, %v1714_v63  ;;  %v2395_v58 = vadd.f32 %v2361_v50, %v2245_v5  ;;  %v2396_v50 = vadd.f32 %v2363_v3, %v2246_v53 }
 0x233   : > { %v2732_v57 = vadd.f32 %v2698_v47, %v2395_v58  ;;  %v2368_v14 = vpop.f32.mrf.mxu1  ;;  %v2221_v47 = vpop.f32.mrf.mxu3 }
 0x234   : > { %v2703_v60 = vpop.f32.mrf.mxu0 }
 0x238   : > { %v2893_v46 = vpop.f32.mrf.mxu2 }
 0x239   : > { %v2933_v42 = vadd.f32 %v2893_v46, %v2728_v45  ;;  %v3491_v46 = vunpack.c.h.bf16 %v3516_v8 }
 0x23b   : > { %v2952_v26 = vadd.f32 %v4669_v30, %v2933_v42  ;;  %v2223_v54 = vpop.f32.mrf.mxu3 }
 0x23c   : > { %v2705_v61 = vpop.f32.mrf.mxu0 }
 0x23d   : > { %v2968_v44 = vmul.f32 0.1, %v2952_v26 }
 0x23f   : > { %v2984_v35 = vmax.f32 %v2952_v26, %v2968_v44  ;;  %v3517_v44 = vld [vmem:[%s3692_s12 + $0x10] sm:$0xff]  }
 0x240   : > { %v2895_v48 = vpop.f32.mrf.mxu2 }
 0x241   : > { %v3032_v34 = vadd.f32 %v3486_v56, %v2984_v35  ;;  %v2934_v41 = vadd.f32 %v2895_v48, %v2729_v59  ;;  %v3494_v48 = vunpack.c.l.bf16 %v3517_v44 }
 0x243   : > { %v3048_v7 = vpack.c.bf16 %v3032_v34, %v3032_v34  ;;  %v2953_v22 = vadd.f32 %v4669_v30, %v2934_v41  ;;  %v2733_v41 = vadd.f32 %v2700_v29, %v2396_v50  ;;  %v2248_v29 = vadd.f32 %v2218_v21, %v4624_v13 }
 0x245   : > { %3065 = vst.msk [vmem:[%s4680_s20] sm:$0xf] %vm3064_vm2, %v3048_v7  ;;  %v2969_v28 = vmul.f32 0.1, %v2953_v22  ;;  %v2247_v7 = vadd.f32 %v2216_v9, %v4618_v1 }
 0x247   : > { %v2985_v23 = vmax.f32 %v2953_v22, %v2969_v28  ;;  %v2371_v22 = vpop.f32.mrf.mxu1  ;;  %v2397_v3 = vadd.f32 %v2366_v33, %v2247_v7 }
 0x248   : > { %v2898_v24 = vpop.f32.mrf.mxu2 }
 0x249   : > { %v3033_v55 = vadd.f32 %v3487_v51, %v2985_v23  ;;  %v2935_v20 = vadd.f32 %v2898_v24, %v2730_v39  ;;  %v3495_v39 = vunpack.c.h.bf16 %v3517_v44  ;;  %v2734_v52 = vadd.f32 %v2703_v60, %v2397_v3 }
 0x24b   : > { %v3049_v10 = vpack.c.bf16 %v3033_v55, %v3033_v55  ;;  %v2954_v18 = vadd.f32 %v4669_v30, %v2935_v20  ;;  %v2708_v55 = vpop.f32.mrf.mxu0 }
 0x24d   : > { %3066 = vst.msk [vmem:[%s4680_s20 + $0x4] sm:$0xf] %vm3064_vm2, %v3049_v10  ;;  %v2970_v32 = vmul.f32 0.1, %v2954_v18  ;;  %v3518_v10 = vld [vmem:[%s3692_s12 + $0x18] sm:$0xff]  }
 0x24e   : > { %v3499_v21 = vunpack.c.h.bf16 %v3518_v10 }
 0x24f   : > { %v2986_v31 = vmax.f32 %v2954_v18, %v2970_v32  ;;  %v2398_v18 = vadd.f32 %v2368_v14, %v2248_v29 }
 0x250   : > { %v2900_v6 = vpop.f32.mrf.mxu2 }
 0x251   : > { %v3034_v27 = vadd.f32 %v3490_v25, %v2986_v31  ;;  %v2936_v63 = vadd.f32 %v2900_v6, %v2731_v12  ;;  %v2373_v25 = vpop.f32.mrf.mxu1  ;;  %v3498_v31 = vunpack.c.l.bf16 %v3518_v10  ;;  %v2735_v6 = vadd.f32 %v2705_v61, %v2398_v18 }
 0x253   : > { %v3050_v16 = vpack.c.bf16 %v3034_v27, %v3034_v27  ;;  %v2955_v19 = vadd.f32 %v4669_v30, %v2936_v63  ;;  %v2249_v27 = vadd.f32 %v2221_v47, %v4630_v15  ;;  %v2710_v58 = vpop.f32.mrf.mxu0  ;;  %v2250_v15 = vadd.f32 %v2223_v54, %v4633_v11 }
 0x255   : > { %3067 = vst.msk [vmem:[%s4680_s20 + $0x8] sm:$0xf] %vm3064_vm2, %v3050_v16  ;;  %v2971_v45 = vmul.f32 0.1, %v2955_v19  ;;  %v2399_v16 = vadd.f32 %v2371_v22, %v2249_v27  ;;  %v2400_v44 = vadd.f32 %v2373_v25, %v2250_v15 }
 0x257   : > { %v2987_v42 = vmax.f32 %v2955_v19, %v2971_v45  ;;  %v2226_v45 = vpop.f32.mrf.mxu3  ;;  %v2736_v14 = vadd.f32 %v2708_v55, %v2399_v16 }
 0x258   : > { %v2903_v2 = vpop.f32.mrf.mxu2  ;;  %v2251_v11 = vadd.f32 %v2226_v45, %v4640_v43 }
 0x259   : > { %v3035_v62 = vadd.f32 %v3491_v46, %v2987_v42  ;;  %v2937_v26 = vadd.f32 %v2903_v2, %v2732_v57  ;;  %v2376_v42 = vpop.f32.mrf.mxu1 }
 0x25b   : > { %v3051_v56 = vpack.c.bf16 %v3035_v62, %v3035_v62  ;;  %v2956_v35 = vadd.f32 %v4669_v30, %v2937_v26  ;;  %v3519_v26 = vld [vmem:[%s3692_s12 + $0x20] sm:$0xff]  }
 0x25d   : > { %3068 = vst.msk [vmem:[%s4680_s20 + $0xc] sm:$0xf] %vm3064_vm2, %v3051_v56  ;;  %v2972_v59 = vmul.f32 0.1, %v2956_v35 }
 0x25f   : > { %v2988_v34 = vmax.f32 %v2956_v35, %v2972_v59  ;;  %v2713_v35 = vpop.f32.mrf.mxu0  ;;  %v2228_v61 = vpop.f32.mrf.mxu3 }
 0x260   : > { %v2905_v36 = vpop.f32.mrf.mxu2 }
 0x261   : > { %v3036_v0 = vadd.f32 %v3494_v48, %v2988_v34  ;;  %v2938_v37 = vadd.f32 %v2905_v36, %v2733_v41  ;;  %v3502_v48 = vunpack.c.l.bf16 %v3519_v26  ;;  %v2737_v41 = vadd.f32 %v2710_v58, %v2400_v44  ;;  %v2378_v47 = vpop.f32.mrf.mxu1 }
 0x263   : > { %v3052_v28 = vpack.c.bf16 %v3036_v0, %v3036_v0  ;;  %v2957_v51 = vadd.f32 %v4669_v30, %v2938_v37  ;;  %v2401_v37 = vadd.f32 %v2376_v42, %v2251_v11 }
 0x265   : > { %3069 = vst.msk [vmem:[%s4680_s20 + $0x10] sm:$0xf] %vm3064_vm2, %v3052_v28  ;;  %v2973_v23 = vmul.f32 0.1, %v2957_v51 }
 0x267   : > { %v2989_v24 = vmax.f32 %v2957_v51, %v2973_v23  ;;  %v3503_v51 = vunpack.c.h.bf16 %v3519_v26  ;;  %v2715_v23 = vpop.f32.mrf.mxu0 }
 0x268   : > { %v2908_v20 = vpop.f32.mrf.mxu2 }
 0x269   : > { %v3037_v1 = vadd.f32 %v3495_v39, %v2989_v24  ;;  %v2939_v8 = vadd.f32 %v2908_v20, %v2734_v52  ;;  %v2738_v24 = vadd.f32 %v2713_v35, %v2401_v37  ;;  %v2231_v52 = vpop.f32.mrf.mxu3  ;;  %v2252_v20 = vadd.f32 %v2228_v61, %v4646_v49 }
 0x26b   : > { %v3053_v9 = vpack.c.bf16 %v3037_v1, %v3037_v1  ;;  %v2958_v32 = vadd.f32 %v4669_v30, %v2939_v8  ;;  %v2381_v1 = vpop.f32.mrf.mxu1  ;;  %v3520_v8 = vld [vmem:[%s3692_s12 + $0x28] sm:$0xff]   ;;  %v2402_v54 = vadd.f32 %v2378_v47, %v2252_v20 }
 0x26d   : > { %3070 = vst.msk [vmem:[%s4680_s20 + $0x14] sm:$0xf] %vm3064_vm2, %v3053_v9  ;;  %v2974_v33 = vmul.f32 0.1, %v2958_v32 }
 0x26f   : > { %v2990_v12 = vmax.f32 %v2958_v32, %v2974_v33  ;;  %v3506_v32 = vunpack.c.l.bf16 %v3520_v8  ;;  %v2739_v33 = vadd.f32 %v2715_v23, %v2402_v54 }
 0x270   : > { %v2910_v5 = vpop.f32.mrf.mxu2 }
 0x271   : > { %v3038_v13 = vadd.f32 %v3498_v31, %v2990_v12  ;;  %v2940_v63 = vadd.f32 %v2910_v5, %v2735_v6  ;;  %v2718_v31 = vpop.f32.mrf.mxu0  ;;  %v2253_v6 = vadd.f32 %v2231_v52, %v4652_v38  ;;  %v2233_v27 = vpop.f32.mrf.mxu3 }
 0x272   : > { %v2254_v42 = vadd.f32 %v2233_v27, %v4658_v40 }
 0x273   : > { %v3054_v19 = vpack.c.bf16 %v3038_v13, %v3038_v13  ;;  %v2959_v60 = vadd.f32 %v4669_v30, %v2940_v63  ;;  %v2403_v13 = vadd.f32 %v2381_v1, %v2253_v6  ;;  %v2383_v16 = vpop.f32.mrf.mxu1 }
 0x274   : > { %v2404_v15 = vadd.f32 %v2383_v16, %v2254_v42 }
 0x275   : > { %3071 = vst.msk [vmem:[%s4680_s20 + $0x18] sm:$0xf] %vm3064_vm2, %v3054_v19  ;;  %v2975_v46 = vmul.f32 0.1, %v2959_v60 }
 0x277   : > { %v2991_v57 = vmax.f32 %v2959_v60, %v2975_v46  ;;  %v3507_v60 = vunpack.c.h.bf16 %v3520_v8  ;;  %v2740_v46 = vadd.f32 %v2718_v31, %v2403_v13 }
 0x278   : > { %v2913_v2 = vpop.f32.mrf.mxu2 }
 0x279   : > { %v3039_v53 = vadd.f32 %v3499_v21, %v2991_v57  ;;  %v2941_v62 = vadd.f32 %v2913_v2, %v2736_v14  ;;  %v2720_v14 = vpop.f32.mrf.mxu0  ;;  %v3521_v2 = vld [vmem:[%s3692_s12 + $0x30] sm:$0xff]   ;;  %v2236_v26 = vpop.f32.mrf.mxu3 }
 0x27a   : > { %v2255_v40 = vadd.f32 %v2236_v26, %v4661_v17 }
 0x27b   : > { %v3055_v50 = vpack.c.bf16 %v3039_v53, %v3039_v53  ;;  %v2960_v56 = vadd.f32 %v4669_v30, %v2941_v62 }
 0x27d   : > { %3072 = vst.msk [vmem:[%s4680_s20 + $0x1c] sm:$0xf] %vm3064_vm2, %v3055_v50  ;;  %v2976_v59 = vmul.f32 0.1, %v2960_v56  ;;  %v3510_v50 = vunpack.c.l.bf16 %v3521_v2 }
 0x27f   : > { %v2992_v34 = vmax.f32 %v2960_v56, %v2976_v59  ;;  %v2386_v56 = vpop.f32.mrf.mxu1  ;;  %v2741_v59 = vadd.f32 %v2720_v14, %v2404_v15 }
 0x280   : > { %v2915_v36 = vpop.f32.mrf.mxu2 }
 0x281   : > { %v3040_v7 = vadd.f32 %v3502_v48, %v2992_v34  ;;  %v2942_v0 = vadd.f32 %v2915_v36, %v2737_v41  ;;  %v2405_v41 = vadd.f32 %v2386_v56, %v2255_v40  ;;  %v2723_v11 = vpop.f32.mrf.mxu0  ;;  %v2238_v37 = vpop.f32.mrf.mxu3 }
 0x282   : > { %v2256_v17 = vadd.f32 %v2238_v37, %v4664_v4 }
 0x283   : > { %v3056_v22 = vpack.c.bf16 %v3040_v7, %v3040_v7  ;;  %v2961_v3 = vadd.f32 %v4669_v30, %v2942_v0  ;;  %v3511_v0 = vunpack.c.h.bf16 %v3521_v2 }
 0x285   : > { %3073 = vst.msk [vmem:[%s4680_s20 + $0x20] sm:$0xf] %vm3064_vm2, %v3056_v22  ;;  %v2977_v28 = vmul.f32 0.1, %v2961_v3 }
 0x287   : > { %v2993_v39 = vmax.f32 %v2961_v3, %v2977_v28  ;;  %v2742_v3 = vadd.f32 %v2723_v11, %v2405_v41  ;;  %v2388_v28 = vpop.f32.mrf.mxu1 }
 0x288   : > { %v2918_v55 = vpop.f32.mrf.mxu2  ;;  %v2406_v52 = vadd.f32 %v2388_v28, %v2256_v17 }
 0x289   : > { %v3041_v43 = vadd.f32 %v3503_v51, %v2993_v39  ;;  %v2943_v29 = vadd.f32 %v2918_v55, %v2738_v24  ;;  %v3522_v24 = vld [vmem:[%s3692_s12 + $0x38] sm:$0xff]   ;;  %v2725_v1 = vpop.f32.mrf.mxu0 }
 0x28a   : > { %v2743_v54 = vadd.f32 %v2725_v1, %v2406_v52 }
 0x28b   : > { %v3057_v10 = vpack.c.bf16 %v3041_v43, %v3041_v43  ;;  %v2962_v18 = vadd.f32 %v4669_v30, %v2943_v29  ;;  %v3514_v29 = vunpack.c.l.bf16 %v3522_v24 }
 0x28d   : > { %3074 = vst.msk [vmem:[%s4680_s20 + $0x24] sm:$0xf] %vm3064_vm2, %v3057_v10  ;;  %v2978_v9 = vmul.f32 0.1, %v2962_v18 }
 0x28f   : > { %v2994_v25 = vmax.f32 %v2962_v18, %v2978_v9 }
 0x290   : > { %v2920_v12 = vpop.f32.mrf.mxu2 }
 0x291   : > { %v3042_v49 = vadd.f32 %v3506_v32, %v2994_v25  ;;  %v2944_v5 = vadd.f32 %v2920_v12, %v2739_v33  ;;  %v3515_v33 = vunpack.c.h.bf16 %v3522_v24 }
 0x293   : > { %v3058_v63 = vpack.c.bf16 %v3042_v49, %v3042_v49  ;;  %v2963_v58 = vadd.f32 %v4669_v30, %v2944_v5 }
 0x295   : > { %3075 = vst.msk [vmem:[%s4680_s20 + $0x28] sm:$0xf] %vm3064_vm2, %v3058_v63  ;;  %v2979_v19 = vmul.f32 0.1, %v2963_v58 }
 0x297   : > { %v2995_v45 = vmax.f32 %v2963_v58, %v2979_v19 }
 0x298   : > { %v2923_v21 = vpop.f32.mrf.mxu2 }
 0x299   : > { %v3043_v38 = vadd.f32 %v3507_v60, %v2995_v45  ;;  %v2945_v57 = vadd.f32 %v2923_v21, %v2740_v46 }
 0x29b   : > { %v3059_v53 = vpack.c.bf16 %v3043_v38, %v3043_v38  ;;  %v2964_v62 = vadd.f32 %v4669_v30, %v2945_v57 }
 0x29d   : > { %3076 = vst.msk [vmem:[%s4680_s20 + $0x2c] sm:$0xf] %vm3064_vm2, %v3059_v53  ;;  %v2980_v44 = vmul.f32 0.1, %v2964_v62 }
 0x29f   : > { %v2996_v35 = vmax.f32 %v2964_v62, %v2980_v44 }
 0x2a0   : > { %v2925_v48 = vpop.f32.mrf.mxu2 }
 0x2a1   : > { %v3044_v61 = vadd.f32 %v3510_v50, %v2996_v35  ;;  %v2946_v34 = vadd.f32 %v2925_v48, %v2741_v59 }
 0x2a3   : > { %v3060_v47 = vpack.c.bf16 %v3044_v61, %v3044_v61  ;;  %v2965_v36 = vadd.f32 %v4669_v30, %v2946_v34 }
 0x2a5   : > { %3077 = vst.msk [vmem:[%s4680_s20 + $0x30] sm:$0xf] %vm3064_vm2, %v3060_v47  ;;  %v2981_v7 = vmul.f32 0.1, %v2965_v36 }
 0x2a7   : > { %v2997_v22 = vmax.f32 %v2965_v36, %v2981_v7 }
 0x2a8   : > { %v2928_v51 = vpop.f32.mrf.mxu2 }
 0x2a9   : > { %v3045_v23 = vadd.f32 %v3511_v0, %v2997_v22  ;;  %v2947_v39 = vadd.f32 %v2928_v51, %v2742_v3 }
 0x2ab   : > { %v3061_v55 = vpack.c.bf16 %v3045_v23, %v3045_v23  ;;  %v2966_v20 = vadd.f32 %v4669_v30, %v2947_v39 }
 0x2ad   : > { %3078 = vst.msk [vmem:[%s4680_s20 + $0x34] sm:$0xf] %vm3064_vm2, %v3061_v55  ;;  %v2982_v43 = vmul.f32 0.1, %v2966_v20 }
 0x2af   : > { %v2998_v8 = vmax.f32 %v2966_v20, %v2982_v43 }
 0x2b0   : > { %v2930_v10 = vpop.f32.mrf.mxu2 }
 0x2b1   : > { %v3046_v18 = vadd.f32 %v3514_v29, %v2998_v8  ;;  %v2948_v9 = vadd.f32 %v2930_v10, %v2743_v54 }
 0x2b3   : > { %v3062_v4 = vpack.c.bf16 %v3046_v18, %v3046_v18  ;;  %v2967_v32 = vadd.f32 %v4669_v30, %v2948_v9 }
 0x2b5   : > { %3079 = vst.msk [vmem:[%s4680_s20 + $0x38] sm:$0xf] %vm3064_vm2, %v3062_v4  ;;  %v2983_v25 = vmul.f32 0.1, %v2967_v32 }
 0x2b7   : > { %v2999_v31 = vmax.f32 %v2967_v32, %v2983_v25 }
 0x2b9   : > { %v3047_v12 = vadd.f32 %v3515_v33, %v2999_v31 }
 0x2bb   : > { %v3063_v6 = vpack.c.bf16 %v3047_v12, %v3047_v12 }
 0x2bd   : > { %3080 = vst.msk [vmem:[%s4680_s20 + $0x3c] sm:$0xf] %vm3064_vm2, %v3063_v6 }
 0x2be PF: > { %s16_s25 = sadd.s32 1, %s3610_s25   ;;  %s4783_s21 = smov %s3602_s23 }
 0x2bf   : > { %p13_p9 = scmp.ge.s32.totalorder %s16_s25, 6   ;;  %s4784_s22 = smov %s3606_s24 }
 0x2c0   : > { %s4785_s23 = smov %s4788_s26  ;;  %s4786_s24 = smov %s4792_s27 }
 0x2c1   :  { %15 = sbr.rel (!%p13_p9) target bundleno = 3 (0x3), region = 80 }

</bundles_post_ra>
